<compile_context>
chip_gen: v7x
topology: tpu7x:2x2x1
jax: 0.10.0
libtpu: 0.0.40
codegen_flags: <defaults>
</compile_context>

<pallas_src>
import functools
import math

import jax
import jax.numpy as jnp
from jax.experimental import pallas as pl
from jax.experimental.pallas import tpu as pltpu

_NEG_BIG = -1e30  # finite stand-in for -inf inside kernels (exp underflows to exactly 0)


def _vmem_specs(n):
    return [pl.BlockSpec(memory_space=pltpu.MemorySpace.VMEM) for _ in range(n)]


def _lstm_gates(gates, c_prev, H):
    # gate order i, f, g, o (PyTorch convention).  H=32 lane slices of a [B, 4H]
    # row are sub-lane but negligible at this size.
    i = jax.nn.sigmoid(gates[:, 0 * H:1 * H])
    f = jax.nn.sigmoid(gates[:, 1 * H:2 * H])
    g = jnp.tanh(gates[:, 2 * H:3 * H])
    o = jax.nn.sigmoid(gates[:, 3 * H:4 * H])
    c_new = f * c_prev + i * g
    h_new = o * jnp.tanh(c_new)
    return h_new, c_new


def _masked_softmax(logits):
    m = jnp.max(logits, axis=-1, keepdims=True)
    e = jnp.exp(logits - m)
    return e / jnp.sum(e, axis=-1, keepdims=True)


# -------------------- prep kernel: embedding + hoisted input projections --------------------

def _prep_kernel(x_ref, emb_ref, enc_wih_ref, enc_b_ref, dec_wih_ref, dec_b_ref,
                 start_ref, gx_enc_ref, gx_dec_ref, gx_start_ref):
    # x: [B, S, 2]  emb: [2, E]  *_wih: [E, 4H]  *_b: [1, 4H]  start: [1, E]
    x = x_ref[...]
    emb = emb_ref[...]
    B, S, _ = x.shape
    E = emb.shape[1]
    H4 = enc_wih_ref.shape[1]
    # GraphEmbedding: bmm([B,S,1,2],[2,E]) == weighted sum of the two embedding rows.
    embedded = (x[:, :, 0:1] * emb[0:1, :][None, :, :]
                + x[:, :, 1:2] * emb[1:2, :][None, :, :])          # [B, S, E]
    emb_flat = embedded.reshape(B * S, E)
    gxe = jnp.dot(emb_flat, enc_wih_ref[...],
                  preferred_element_type=jnp.float32) + enc_b_ref[...]
    gx_enc_ref[...] = gxe.reshape(B, S, H4)
    gxd = jnp.dot(emb_flat, dec_wih_ref[...],
                  preferred_element_type=jnp.float32) + dec_b_ref[...]
    gx_dec_ref[...] = gxd.reshape(B, S, H4)
    gxs = jnp.dot(start_ref[...], dec_wih_ref[...],
                  preferred_element_type=jnp.float32) + dec_b_ref[...]   # [1, 4H]
    gx_start_ref[...] = jnp.broadcast_to(gxs, gx_start_ref.shape)


def prep_projections(x_bs2, params):
    B, S, _ = x_bs2.shape
    H4 = params['enc_wih_t'].shape[1]
    return pl.pallas_call(
        _prep_kernel,
        out_shape=(jax.ShapeDtypeStruct((B, S, H4), jnp.float32),
                   jax.ShapeDtypeStruct((B, S, H4), jnp.float32),
                   jax.ShapeDtypeStruct((B, H4), jnp.float32)),
        in_specs=_vmem_specs(7),
        out_specs=tuple(_vmem_specs(3)),
    )(x_bs2, params['embedding'], params['enc_wih_t'], params['enc_b'],
      params['dec_wih_t'], params['dec_b'], params['decoder_start'][None, :])


# -------------------- fused encoder: whole sequence in one grid=(S,) kernel --------------------

def _encoder_kernel(gx_ref, whh_ref, enc_out_ref, h_out_ref, c_out_ref, h_sc, c_sc):
    # gx block: [1, B, 4H]  whh: [H, 4H]  enc_out block: [1, B, H]  h/c scratch: [B, H]
    t = pl.program_id(0)

    @pl.when(t == 0)
    def _():
        h_sc[...] = jnp.zeros_like(h_sc)
        c_sc[...] = jnp.zeros_like(c_sc)

    H = h_sc.shape[1]
    gates = gx_ref[0] + jnp.dot(h_sc[...], whh_ref[...],
                                preferred_element_type=jnp.float32)
    h_new, c_new = _lstm_gates(gates, c_sc[...], H)
    h_sc[...] = h_new
    c_sc[...] = c_new
    enc_out_ref[0] = h_new
    h_out_ref[...] = h_new
    c_out_ref[...] = c_new


def run_encoder(gx_enc_sbh, whh_t):
    S, B, H4 = gx_enc_sbh.shape
    H = H4 // 4
    return pl.pallas_call(
        _encoder_kernel,
        out_shape=(jax.ShapeDtypeStruct((S, B, H), jnp.float32),
                   jax.ShapeDtypeStruct((B, H), jnp.float32),
                   jax.ShapeDtypeStruct((B, H), jnp.float32)),
        grid_spec=pltpu.PrefetchScalarGridSpec(
            num_scalar_prefetch=0,
            grid=(S,),
            in_specs=[pl.BlockSpec((1, B, H4), lambda t: (t, 0, 0)),
                      pl.BlockSpec((H, H4), lambda t: (0, 0))],
            out_specs=(pl.BlockSpec((1, B, H), lambda t: (t, 0, 0)),
                       pl.BlockSpec((B, H), lambda t: (0, 0)),
                       pl.BlockSpec((B, H), lambda t: (0, 0))),
            scratch_shapes=[pltpu.VMEM((B, H), jnp.float32),
                            pltpu.VMEM((B, H), jnp.float32)]),
        compiler_params=pltpu.CompilerParams(dimension_semantics=("arbitrary",)),
    )(gx_enc_sbh, whh_t)


# -------------------- step-invariant reference projections (hoisted) --------------------

def _refproj_kernel(enc_ref, glm_wr_ref, glm_br_ref, ptr_wr_ref, ptr_br_ref,
                    e_glm_ref, e_ptr_ref):
    # Conv1d(H, H, 1) over the ref == per-position linear layer, computed ONCE.
    enc = enc_ref[...]                          # [B, S, H]
    B, S, H = enc.shape
    flat = enc.reshape(B * S, H)
    eg = jnp.dot(flat, glm_wr_ref[...], preferred_element_type=jnp.float32) + glm_br_ref[...]
    ep = jnp.dot(flat, ptr_wr_ref[...], preferred_element_type=jnp.float32) + ptr_br_ref[...]
    e_glm_ref[...] = eg.reshape(B, S, H)
    e_ptr_ref[...] = ep.reshape(B, S, H)


def ref_projections(encoder_outputs, params):
    B, S, H = encoder_outputs.shape
    return pl.pallas_call(
        _refproj_kernel,
        out_shape=(jax.ShapeDtypeStruct((B, S, H), jnp.float32),
                   jax.ShapeDtypeStruct((B, S, H), jnp.float32)),
        in_specs=_vmem_specs(5),
        out_specs=tuple(_vmem_specs(2)),
    )(encoder_outputs, params['glm_wr_t'], params['glm_br'],
      params['ptr_wr_t'], params['ptr_br'])


# -------------------- fused decode step --------------------

def _decode_step_kernel(gx_ref, h_ref, c_ref, mask_ref, whh_ref,
                        e_glm_ref, e_ptr_ref,
                        glm_wq_ref, glm_bq_ref, glm_v_ref,
                        ptr_wq_ref, ptr_bq_ref, ptr_v_ref,
                        h_out_ref, c_out_ref, probs_ref, logits_ref,
                        *, n_glimpses, C, use_tanh):
    H = h_ref.shape[1]
    # decoder LSTM cell (x-projection precomputed: gx = x @ W_ih + b)
    gates = gx_ref[...] + jnp.dot(h_ref[...], whh_ref[...],
                                  preferred_element_type=jnp.float32)
    h_new, c_new = _lstm_gates(gates, c_ref[...], H)
    h_out_ref[...] = h_new
    c_out_ref[...] = c_new

    mask = mask_ref[...] > 0.5                   # [B, S] bool
    e_glm = e_glm_ref[...]                       # [B, S, H]
    e_ptr = e_ptr_ref[...]                       # [B, S, H]

    # glimpse attention(s)
    query = h_new
    for _ in range(n_glimpses):
        q1 = jnp.dot(query, glm_wq_ref[...],
                     preferred_element_type=jnp.float32) + glm_bq_ref[...]
        t1 = jnp.tanh(q1[:, None, :] + e_glm)
        s1 = jnp.sum(t1 * glm_v_ref[...][None, :, :], axis=-1)      # [B, S]
        s1 = jnp.where(mask, _NEG_BIG, s1)
        p1 = _masked_softmax(s1)
        # torch.bmm(ref, p): weighted sum of projected refs over seq
        query = jnp.sum(e_glm * p1[:, :, None], axis=1)             # [B, H]

    # pointer attention
    q2 = jnp.dot(query, ptr_wq_ref[...],
                 preferred_element_type=jnp.float32) + ptr_bq_ref[...]
    t2 = jnp.tanh(q2[:, None, :] + e_ptr)
    s2 = jnp.sum(t2 * ptr_v_ref[...][None, :, :], axis=-1)          # [B, S]
    if use_tanh:
        s2 = C * jnp.tanh(s2)
    else:
        s2 = s2 / 2.0
    s2 = jnp.where(mask, _NEG_BIG, s2)
    logits_ref[...] = s2
    probs_ref[...] = _masked_softmax(s2)


def make_decode_step(B, S, H, *, n_glimpses, C, use_tanh):
    kernel = functools.partial(_decode_step_kernel,
                               n_glimpses=n_glimpses, C=C, use_tanh=use_tanh)
    return pl.pallas_call(
        kernel,
        out_shape=(jax.ShapeDtypeStruct((B, H), jnp.float32),
                   jax.ShapeDtypeStruct((B, H), jnp.float32),
                   jax.ShapeDtypeStruct((B, S), jnp.float32),
                   jax.ShapeDtypeStruct((B, S), jnp.float32)),
        in_specs=_vmem_specs(13),
        out_specs=tuple(_vmem_specs(4)),
    )


# -------------------- forward pass --------------------

def pointer_net_forward(params, inputs, rng_key, *, n_glimpses=1, C=10.0, use_tanh=True):
    """inputs: [B, 2, S] float32 (PyTorch NCL layout).  Returns (probs [S,B,S], idxs [S,B])."""
    B = inputs.shape[0]
    S = inputs.shape[2]
    H = params['enc_whh_t'].shape[0]

    x = jnp.transpose(inputs, (0, 2, 1)).astype(jnp.float32)      # [B, S, 2]

    # embedding + hoisted input projections (one kernel)
    gx_enc_bsh, gx_dec, gx_start = prep_projections(x, params)    # [B,S,4H], [B,S,4H], [B,4H]
    gx_enc = jnp.transpose(gx_enc_bsh, (1, 0, 2))                 # [S, B, 4H]

    # encoder: whole sequence in one grid kernel, h/c carried in VMEM scratch
    enc_out_sbh, h, c = run_encoder(gx_enc, params['enc_whh_t'])
    encoder_outputs = jnp.transpose(enc_out_sbh, (1, 0, 2))       # [B, S, H]

    # step-invariant W_ref projections (hoisted out of the decode loop)
    e_glm, e_ptr = ref_projections(encoder_outputs, params)

    decode_step = make_decode_step(B, S, H, n_glimpses=n_glimpses, C=C, use_tanh=use_tanh)

    mask = jnp.zeros((B, S), jnp.float32)
    gx = gx_start
    idxs = None
    bidx = jnp.arange(B)
    step_keys = jax.random.split(rng_key, S)
    prev_probs, prev_idxs = [], []

    for step in range(S):
        # apply_mask_to_logits: only updates the mask once idxs exists (step > 0)
        if idxs is not None:
            mask = mask.at[bidx, idxs].set(1.0)
        h, c, probs, logits = decode_step(
            gx, h, c, mask, params['dec_whh_t'], e_glm, e_ptr,
            params['glm_wq_t'], params['glm_bq'], params['glm_v'],
            params['ptr_wq_t'], params['ptr_bq'], params['ptr_v'])
        # torch multinomial(1) == categorical sample from the masked distribution.
        idxs = jax.random.categorical(step_keys[step], logits, axis=1)
        # TODO(synk): PyTorch's data-dependent "RESAMPLE!" retry on index collision is
        # omitted; masking makes such collisions probability ~0 anyway.
        gx = gx_dec[bidx, idxs, :]      # == (embedded[b, idx] @ W_ih_dec + b), precomputed
        prev_probs.append(probs)
        prev_idxs.append(idxs)

    return jnp.stack(prev_probs, axis=0), jnp.stack(prev_idxs, axis=0)


# -------------------- deterministic parameter init --------------------

def init_params(key, embedding_size, hidden_size):
    E, H = embedding_size, hidden_size
    ks = jax.random.split(key, 20)
    k = iter(ks)
    u = lambda kk, shape, s: jax.random.uniform(kk, shape, jnp.float32, -s, s)
    se = 1.0 / math.sqrt(E)
    sh = 1.0 / math.sqrt(H)

    params = {
        # GraphEmbedding(2, E)
        'embedding': u(next(k), (2, E), se),
        # encoder / decoder LSTMs: stored pre-transposed ([in, 4H]), gate order i,f,g,o
        'enc_wih_t': u(next(k), (E, 4 * H), sh),
        'enc_whh_t': u(next(k), (H, 4 * H), sh),
        'enc_b':     u(next(k), (1, 4 * H), sh),
        'dec_wih_t': u(next(k), (E, 4 * H), sh),
        'dec_whh_t': u(next(k), (H, 4 * H), sh),
        'dec_b':     u(next(k), (1, 4 * H), sh),
        # glimpse attention (Bahdanau)
        'glm_wq_t': u(next(k), (H, H), sh),
        'glm_bq':   u(next(k), (1, H), sh),
        'glm_wr_t': u(next(k), (H, H), sh),   # Conv1d(H,H,1) weight, squeezed & transposed
        'glm_br':   u(next(k), (1, H), sh),
        'glm_v':    u(next(k), (1, H), sh),
        # pointer attention (Bahdanau)
        'ptr_wq_t': u(next(k), (H, H), sh),
        'ptr_bq':   u(next(k), (1, H), sh),
        'ptr_wr_t': u(next(k), (H, H), sh),
        'ptr_br':   u(next(k), (1, H), sh),
        'ptr_v':    u(next(k), (1, H), sh),
        # decoder start token
        'decoder_start': u(next(k), (E,), se),
    }
    return params


if __name__ == "__main__":
    batch = 2
    seq_len = 8
    embedding_size = 32
    hidden_size = 32

    root = jax.random.PRNGKey(0)
    k_params, k_inputs, k_sample = jax.random.split(root, 3)

    params = init_params(k_params, embedding_size, hidden_size)
    # inputs: [batch, 2, seq_len]  (2D city coordinates, PyTorch NCL layout)
    inputs = jax.random.uniform(k_inputs, (batch, 2, seq_len), jnp.float32)

    fwd = jax.jit(lambda p, x, k: pointer_net_forward(
        p, x, k, n_glimpses=1, C=10.0, use_tanh=True))

    probs, idxs = fwd(params, inputs, k_sample)
    probs = jax.block_until_ready(probs)
    idxs = jax.block_until_ready(idxs)

    assert probs.shape == (seq_len, batch, seq_len)
    assert idxs.shape == (seq_len, batch)
    # each per-step distribution sums to 1
    assert bool(jnp.all(jnp.abs(jnp.sum(probs, axis=-1) - 1.0) < 1e-4))
    # sampled indices lie in range
    assert bool(jnp.all((idxs >= 0) & (idxs < seq_len)))
    print("KERNEL_OK")
</pallas_src>

<mosaic_0001>
module attributes {stable_mosaic.version = 11 : i64} {
  func.func @_prep_kernel(%arg0: memref<2x8x2xf32, #tpu.memory_space<vmem>>, %arg1: memref<2x32xf32, #tpu.memory_space<vmem>>, %arg2: memref<32x128xf32, #tpu.memory_space<vmem>>, %arg3: memref<1x128xf32, #tpu.memory_space<vmem>>, %arg4: memref<32x128xf32, #tpu.memory_space<vmem>>, %arg5: memref<1x128xf32, #tpu.memory_space<vmem>>, %arg6: memref<1x32xf32, #tpu.memory_space<vmem>>, %arg7: memref<2x8x128xf32, #tpu.memory_space<vmem>>, %arg8: memref<2x8x128xf32, #tpu.memory_space<vmem>>, %arg9: memref<2x128xf32, #tpu.memory_space<vmem>>) attributes {dimension_semantics = [], scalar_prefetch = 0 : i64, scratch_operands = 0 : i64, tpu.core_type = #tpu.core_type<tc>} {
    %c0 = arith.constant 0 : index
    %c0_0 = arith.constant 0 : index
    %c0_1 = arith.constant 0 : index
    %0 = vector.load %arg0[%c0, %c0_0, %c0_1] : memref<2x8x2xf32, #tpu.memory_space<vmem>>, vector<2x8x2xf32>
    %c0_2 = arith.constant 0 : index
    %c0_3 = arith.constant 0 : index
    %1 = vector.load %arg1[%c0_2, %c0_3] : memref<2x32xf32, #tpu.memory_space<vmem>>, vector<2x32xf32>
    %2 = vector.extract_strided_slice %0 {offsets = [0, 0, 0], sizes = [2, 8, 1], strides = [1, 1, 1]} : vector<2x8x2xf32> to vector<2x8x1xf32>
    %3 = vector.extract_strided_slice %1 {offsets = [0, 0], sizes = [1, 32], strides = [1, 1]} : vector<2x32xf32> to vector<1x32xf32>
    %4 = vector.shape_cast %3 : vector<1x32xf32> to vector<1x1x32xf32>
    %5 = vector.broadcast %2 : vector<2x8x1xf32> to vector<2x8x32xf32>
    %6 = vector.broadcast %4 : vector<1x1x32xf32> to vector<2x8x32xf32>
    %7 = arith.mulf %5, %6 : vector<2x8x32xf32>
    %8 = vector.extract_strided_slice %0 {offsets = [0, 0, 1], sizes = [2, 8, 1], strides = [1, 1, 1]} : vector<2x8x2xf32> to vector<2x8x1xf32>
    %9 = vector.extract_strided_slice %1 {offsets = [1, 0], sizes = [1, 32], strides = [1, 1]} : vector<2x32xf32> to vector<1x32xf32>
    %10 = vector.shape_cast %9 : vector<1x32xf32> to vector<1x1x32xf32>
    %11 = vector.broadcast %8 : vector<2x8x1xf32> to vector<2x8x32xf32>
    %12 = vector.broadcast %10 : vector<1x1x32xf32> to vector<2x8x32xf32>
    %13 = arith.mulf %11, %12 : vector<2x8x32xf32>
    %14 = arith.addf %7, %13 : vector<2x8x32xf32>
    %15 = vector.shape_cast %14 : vector<2x8x32xf32> to vector<16x32xf32>
    %c0_4 = arith.constant 0 : index
    %c0_5 = arith.constant 0 : index
    %16 = vector.load %arg2[%c0_4, %c0_5] : memref<32x128xf32, #tpu.memory_space<vmem>>, vector<32x128xf32>
    %cst = arith.constant dense<0.000000e+00> : vector<16x128xf32>
    %17 = tpu.matmul %15, %16, %cst {dimension_numbers = #tpu.dot_dimension_numbers<[1], [0], [0], [1], [0, 0, 1, 1], [], []>} : vector<16x32xf32>, vector<32x128xf32>, vector<16x128xf32> -> vector<16x128xf32>
    %c0_6 = arith.constant 0 : index
    %c0_7 = arith.constant 0 : index
    %18 = vector.load %arg3[%c0_6, %c0_7] : memref<1x128xf32, #tpu.memory_space<vmem>>, vector<1x128xf32>
    %19 = vector.broadcast %18 : vector<1x128xf32> to vector<16x128xf32>
    %20 = arith.addf %17, %19 : vector<16x128xf32>
    %21 = vector.shape_cast %20 : vector<16x128xf32> to vector<2x8x128xf32>
    %c0_8 = arith.constant 0 : index
    %c0_9 = arith.constant 0 : index
    %c0_10 = arith.constant 0 : index
    %22 = vector.load %arg7[%c0_8, %c0_9, %c0_10] : memref<2x8x128xf32, #tpu.memory_space<vmem>>, vector<2x8x128xf32>
    tpu.vector_store %arg7[%c0_8, %c0_9, %c0_10], %21 {strides = array<i32>} : memref<2x8x128xf32, #tpu.memory_space<vmem>>, vector<2x8x128xf32>,
    %c0_11 = arith.constant 0 : index
    %c0_12 = arith.constant 0 : index
    %23 = vector.load %arg4[%c0_11, %c0_12] : memref<32x128xf32, #tpu.memory_space<vmem>>, vector<32x128xf32>
    %cst_13 = arith.constant dense<0.000000e+00> : vector<16x128xf32>
    %24 = tpu.matmul %15, %23, %cst_13 {dimension_numbers = #tpu.dot_dimension_numbers<[1], [0], [0], [1], [0, 0, 1, 1], [], []>} : vector<16x32xf32>, vector<32x128xf32>, vector<16x128xf32> -> vector<16x128xf32>
    %c0_14 = arith.constant 0 : index
    %c0_15 = arith.constant 0 : index
    %25 = vector.load %arg5[%c0_14, %c0_15] : memref<1x128xf32, #tpu.memory_space<vmem>>, vector<1x128xf32>
    %26 = vector.broadcast %25 : vector<1x128xf32> to vector<16x128xf32>
    %27 = arith.addf %24, %26 : vector<16x128xf32>
    %28 = vector.shape_cast %27 : vector<16x128xf32> to vector<2x8x128xf32>
    %c0_16 = arith.constant 0 : index
    %c0_17 = arith.constant 0 : index
    %c0_18 = arith.constant 0 : index
    %29 = vector.load %arg8[%c0_16, %c0_17, %c0_18] : memref<2x8x128xf32, #tpu.memory_space<vmem>>, vector<2x8x128xf32>
    tpu.vector_store %arg8[%c0_16, %c0_17, %c0_18], %28 {strides = array<i32>} : memref<2x8x128xf32, #tpu.memory_space<vmem>>, vector<2x8x128xf32>,
    %c0_19 = arith.constant 0 : index
    %c0_20 = arith.constant 0 : index
    %30 = vector.load %arg6[%c0_19, %c0_20] : memref<1x32xf32, #tpu.memory_space<vmem>>, vector<1x32xf32>
    %c0_21 = arith.constant 0 : index
    %c0_22 = arith.constant 0 : index
    %31 = vector.load %arg4[%c0_21, %c0_22] : memref<32x128xf32, #tpu.memory_space<vmem>>, vector<32x128xf32>
    %cst_23 = arith.constant dense<0.000000e+00> : vector<1x128xf32>
    %32 = tpu.matmul %30, %31, %cst_23 {dimension_numbers = #tpu.dot_dimension_numbers<[1], [0], [0], [1], [0, 0, 1, 1], [], []>} : vector<1x32xf32>, vector<32x128xf32>, vector<1x128xf32> -> vector<1x128xf32>
    %c0_24 = arith.constant 0 : index
    %c0_25 = arith.constant 0 : index
    %33 = vector.load %arg5[%c0_24, %c0_25] : memref<1x128xf32, #tpu.memory_space<vmem>>, vector<1x128xf32>
    %34 = arith.addf %32, %33 : vector<1x128xf32>
    %35 = vector.shape_cast %34 : vector<1x128xf32> to vector<1x128xf32>
    %36 = vector.broadcast %35 : vector<1x128xf32> to vector<2x128xf32>
    %c0_26 = arith.constant 0 : index
    %c0_27 = arith.constant 0 : index
    %37 = vector.load %arg9[%c0_26, %c0_27] : memref<2x128xf32, #tpu.memory_space<vmem>>, vector<2x128xf32>
    tpu.vector_store %arg9[%c0_26, %c0_27], %36 {strides = array<i32>} : memref<2x128xf32, #tpu.memory_space<vmem>>, vector<2x128xf32>,
    return
  }
}

module attributes {stable_mosaic.version = 11 : i64} {
  func.func @_encoder_kernel(%arg0: i32, %arg1: memref<1x2x128xf32, #tpu.memory_space<vmem>>, %arg2: memref<32x128xf32, #tpu.memory_space<vmem>>, %arg3: memref<1x2x32xf32, #tpu.memory_space<vmem>>, %arg4: memref<2x32xf32, #tpu.memory_space<vmem>>, %arg5: memref<2x32xf32, #tpu.memory_space<vmem>>, %arg6: memref<2x32xf32, #tpu.memory_space<vmem>>, %arg7: memref<2x32xf32, #tpu.memory_space<vmem>>) attributes {dimension_semantics = [#tpu.dimension_semantics<arbitrary>], iteration_bounds = array<i64: 8>, scalar_prefetch = 0 : i64, scratch_operands = 2 : i64, tpu.core_type = #tpu.core_type<tc>, window_params = [{transform_indices = @transform_0, window_bounds = array<i64: 1, 2, 128>}, {pipeline_mode = #tpu.pipeline_mode<synchronous>, transform_indices = @transform_1, window_bounds = array<i64: 32, 128>}, {transform_indices = @transform_2, window_bounds = array<i64: 1, 2, 32>}, {pipeline_mode = #tpu.pipeline_mode<synchronous>, transform_indices = @transform_3, window_bounds = array<i64: 2, 32>}, {pipeline_mode = #tpu.pipeline_mode<synchronous>, transform_indices = @transform_4, window_bounds = array<i64: 2, 32>}]} {
    %c0_i32 = arith.constant 0 : i32
    %0 = arith.cmpi eq, %arg0, %c0_i32 : i32
    %1 = arith.extui %0 : i1 to i32
    %c0_i32_0 = arith.constant 0 : i32
    %2 = arith.cmpi ne, %1, %c0_i32_0 : i32
    scf.if %2 {
      %cst_23 = arith.constant 0.000000e+00 : f32
      %42 = vector.broadcast %cst_23 : f32 to vector<2x32xf32>
      %c0_24 = arith.constant 0 : index
      %c0_25 = arith.constant 0 : index
      %43 = vector.load %arg6[%c0_24, %c0_25] : memref<2x32xf32, #tpu.memory_space<vmem>>, vector<2x32xf32>
      tpu.vector_store %arg6[%c0_24, %c0_25], %42 {strides = array<i32>} : memref<2x32xf32, #tpu.memory_space<vmem>>, vector<2x32xf32>,
      %cst_26 = arith.constant 0.000000e+00 : f32
      %44 = vector.broadcast %cst_26 : f32 to vector<2x32xf32>
      %c0_27 = arith.constant 0 : index
      %c0_28 = arith.constant 0 : index
      %45 = vector.load %arg7[%c0_27, %c0_28] : memref<2x32xf32, #tpu.memory_space<vmem>>, vector<2x32xf32>
      tpu.vector_store %arg7[%c0_27, %c0_28], %44 {strides = array<i32>} : memref<2x32xf32, #tpu.memory_space<vmem>>, vector<2x32xf32>,
    } else {
    }
    %c0 = arith.constant 0 : index
    %c0_1 = arith.constant 0 : index
    %c0_2 = arith.constant 0 : index
    %3 = vector.load %arg1[%c0, %c0_1, %c0_2] : memref<1x2x128xf32, #tpu.memory_space<vmem>>, vector<1x2x128xf32>
    %4 = vector.shape_cast %3 : vector<1x2x128xf32> to vector<2x128xf32>
    %c0_3 = arith.constant 0 : index
    %c0_4 = arith.constant 0 : index
    %5 = vector.load %arg6[%c0_3, %c0_4] : memref<2x32xf32, #tpu.memory_space<vmem>>, vector<2x32xf32>
    %c0_5 = arith.constant 0 : index
    %c0_6 = arith.constant 0 : index
    %6 = vector.load %arg2[%c0_5, %c0_6] : memref<32x128xf32, #tpu.memory_space<vmem>>, vector<32x128xf32>
    %cst = arith.constant dense<0.000000e+00> : vector<2x128xf32>
    %7 = tpu.matmul %5, %6, %cst {dimension_numbers = #tpu.dot_dimension_numbers<[1], [0], [0], [1], [0, 0, 1, 1], [], []>} : vector<2x32xf32>, vector<32x128xf32>, vector<2x128xf32> -> vector<2x128xf32>
    %8 = arith.addf %4, %7 : vector<2x128xf32>
    %c0_7 = arith.constant 0 : index
    %c0_8 = arith.constant 0 : index
    %9 = vector.load %arg7[%c0_7, %c0_8] : memref<2x32xf32, #tpu.memory_space<vmem>>, vector<2x32xf32>
    %10 = vector.extract_strided_slice %8 {offsets = [0, 0], sizes = [2, 32], strides = [1, 1]} : vector<2x128xf32> to vector<2x32xf32>
    %11 = arith.negf %10 : vector<2x32xf32>
    %12 = math.exp %11 : vector<2x32xf32>
    %cst_9 = arith.constant 1.000000e+00 : f32
    %13 = vector.broadcast %cst_9 : f32 to vector<2x32xf32>
    %14 = arith.addf %13, %12 : vector<2x32xf32>
    %15 = arith.divf %13, %14 : vector<2x32xf32>
    %16 = vector.extract_strided_slice %8 {offsets = [0, 32], sizes = [2, 32], strides = [1, 1]} : vector<2x128xf32> to vector<2x32xf32>
    %17 = arith.negf %16 : vector<2x32xf32>
    %18 = math.exp %17 : vector<2x32xf32>
    %cst_10 = arith.constant 1.000000e+00 : f32
    %19 = vector.broadcast %cst_10 : f32 to vector<2x32xf32>
    %20 = arith.addf %19, %18 : vector<2x32xf32>
    %21 = arith.divf %19, %20 : vector<2x32xf32>
    %22 = vector.extract_strided_slice %8 {offsets = [0, 64], sizes = [2, 32], strides = [1, 1]} : vector<2x128xf32> to vector<2x32xf32>
    %23 = math.tanh %22 : vector<2x32xf32>
    %24 = vector.extract_strided_slice %8 {offsets = [0, 96], sizes = [2, 32], strides = [1, 1]} : vector<2x128xf32> to vector<2x32xf32>
    %25 = arith.negf %24 : vector<2x32xf32>
    %26 = math.exp %25 : vector<2x32xf32>
    %cst_11 = arith.constant 1.000000e+00 : f32
    %27 = vector.broadcast %cst_11 : f32 to vector<2x32xf32>
    %28 = arith.addf %27, %26 : vector<2x32xf32>
    %29 = arith.divf %27, %28 : vector<2x32xf32>
    %30 = arith.mulf %21, %9 : vector<2x32xf32>
    %31 = arith.mulf %15, %23 : vector<2x32xf32>
    %32 = arith.addf %30, %31 : vector<2x32xf32>
    %33 = math.tanh %32 : vector<2x32xf32>
    %34 = arith.mulf %29, %33 : vector<2x32xf32>
    %c0_12 = arith.constant 0 : index
    %c0_13 = arith.constant 0 : index
    %35 = vector.load %arg6[%c0_12, %c0_13] : memref<2x32xf32, #tpu.memory_space<vmem>>, vector<2x32xf32>
    tpu.vector_store %arg6[%c0_12, %c0_13], %34 {strides = array<i32>} : memref<2x32xf32, #tpu.memory_space<vmem>>, vector<2x32xf32>,
    %c0_14 = arith.constant 0 : index
    %c0_15 = arith.constant 0 : index
    %36 = vector.load %arg7[%c0_14, %c0_15] : memref<2x32xf32, #tpu.memory_space<vmem>>, vector<2x32xf32>
    tpu.vector_store %arg7[%c0_14, %c0_15], %32 {strides = array<i32>} : memref<2x32xf32, #tpu.memory_space<vmem>>, vector<2x32xf32>,
    %c0_16 = arith.constant 0 : index
    %c0_17 = arith.constant 0 : index
    %c0_18 = arith.constant 0 : index
    %37 = vector.load %arg3[%c0_16, %c0_17, %c0_18] : memref<1x2x32xf32, #tpu.memory_space<vmem>>, vector<1x2x32xf32>
    %38 = vector.shape_cast %37 : vector<1x2x32xf32> to vector<2x32xf32>
    %39 = vector.shape_cast %34 : vector<2x32xf32> to vector<1x2x32xf32>
    tpu.vector_store %arg3[%c0_16, %c0_17, %c0_18], %39 {strides = array<i32>} : memref<1x2x32xf32, #tpu.memory_space<vmem>>, vector<1x2x32xf32>,
    %c0_19 = arith.constant 0 : index
    %c0_20 = arith.constant 0 : index
    %40 = vector.load %arg4[%c0_19, %c0_20] : memref<2x32xf32, #tpu.memory_space<vmem>>, vector<2x32xf32>
    tpu.vector_store %arg4[%c0_19, %c0_20], %34 {strides = array<i32>} : memref<2x32xf32, #tpu.memory_space<vmem>>, vector<2x32xf32>,
    %c0_21 = arith.constant 0 : index
    %c0_22 = arith.constant 0 : index
    %41 = vector.load %arg5[%c0_21, %c0_22] : memref<2x32xf32, #tpu.memory_space<vmem>>, vector<2x32xf32>
    tpu.vector_store %arg5[%c0_21, %c0_22], %32 {strides = array<i32>} : memref<2x32xf32, #tpu.memory_space<vmem>>, vector<2x32xf32>,
    return
  }
  func.func @transform_0(%arg0: i32) -> (i32, i32, i32) {
    %c0_i32 = arith.constant 0 : i32
    %c0_i32_0 = arith.constant 0 : i32
    %c0_i32_1 = arith.constant 0 : i32
    return %arg0, %c0_i32, %c0_i32_0 : i32, i32, i32
  }
  func.func @transform_1(%arg0: i32) -> (i32, i32) {
    %c0_i32 = arith.constant 0 : i32
    %c0_i32_0 = arith.constant 0 : i32
    %c0_i32_1 = arith.constant 0 : i32
    return %c0_i32, %c0_i32_0 : i32, i32
  }
  func.func @transform_2(%arg0: i32) -> (i32, i32, i32) {
    %c0_i32 = arith.constant 0 : i32
    %c0_i32_0 = arith.constant 0 : i32
    %c0_i32_1 = arith.constant 0 : i32
    return %arg0, %c0_i32, %c0_i32_0 : i32, i32, i32
  }
  func.func @transform_3(%arg0: i32) -> (i32, i32) {
    %c0_i32 = arith.constant 0 : i32
    %c0_i32_0 = arith.constant 0 : i32
    %c0_i32_1 = arith.constant 0 : i32
    return %c0_i32, %c0_i32_0 : i32, i32
  }
  func.func @transform_4(%arg0: i32) -> (i32, i32) {
    %c0_i32 = arith.constant 0 : i32
    %c0_i32_0 = arith.constant 0 : i32
    %c0_i32_1 = arith.constant 0 : i32
    return %c0_i32, %c0_i32_0 : i32, i32
  }
}

module attributes {stable_mosaic.version = 11 : i64} {
  func.func @_refproj_kernel(%arg0: memref<2x8x32xf32, #tpu.memory_space<vmem>>, %arg1: memref<32x32xf32, #tpu.memory_space<vmem>>, %arg2: memref<1x32xf32, #tpu.memory_space<vmem>>, %arg3: memref<32x32xf32, #tpu.memory_space<vmem>>, %arg4: memref<1x32xf32, #tpu.memory_space<vmem>>, %arg5: memref<2x8x32xf32, #tpu.memory_space<vmem>>, %arg6: memref<2x8x32xf32, #tpu.memory_space<vmem>>) attributes {dimension_semantics = [], scalar_prefetch = 0 : i64, scratch_operands = 0 : i64, tpu.core_type = #tpu.core_type<tc>} {
    %c0 = arith.constant 0 : index
    %c0_0 = arith.constant 0 : index
    %c0_1 = arith.constant 0 : index
    %0 = vector.load %arg0[%c0, %c0_0, %c0_1] : memref<2x8x32xf32, #tpu.memory_space<vmem>>, vector<2x8x32xf32>
    %1 = vector.shape_cast %0 : vector<2x8x32xf32> to vector<16x32xf32>
    %c0_2 = arith.constant 0 : index
    %c0_3 = arith.constant 0 : index
    %2 = vector.load %arg1[%c0_2, %c0_3] : memref<32x32xf32, #tpu.memory_space<vmem>>, vector<32x32xf32>
    %cst = arith.constant dense<0.000000e+00> : vector<16x32xf32>
    %3 = tpu.matmul %1, %2, %cst {dimension_numbers = #tpu.dot_dimension_numbers<[1], [0], [0], [1], [0, 0, 1, 1], [], []>} : vector<16x32xf32>, vector<32x32xf32>, vector<16x32xf32> -> vector<16x32xf32>
    %c0_4 = arith.constant 0 : index
    %c0_5 = arith.constant 0 : index
    %4 = vector.load %arg2[%c0_4, %c0_5] : memref<1x32xf32, #tpu.memory_space<vmem>>, vector<1x32xf32>
    %5 = vector.broadcast %4 : vector<1x32xf32> to vector<16x32xf32>
    %6 = arith.addf %3, %5 : vector<16x32xf32>
    %c0_6 = arith.constant 0 : index
    %c0_7 = arith.constant 0 : index
    %7 = vector.load %arg3[%c0_6, %c0_7] : memref<32x32xf32, #tpu.memory_space<vmem>>, vector<32x32xf32>
    %cst_8 = arith.constant dense<0.000000e+00> : vector<16x32xf32>
    %8 = tpu.matmul %1, %7, %cst_8 {dimension_numbers = #tpu.dot_dimension_numbers<[1], [0], [0], [1], [0, 0, 1, 1], [], []>} : vector<16x32xf32>, vector<32x32xf32>, vector<16x32xf32> -> vector<16x32xf32>
    %c0_9 = arith.constant 0 : index
    %c0_10 = arith.constant 0 : index
    %9 = vector.load %arg4[%c0_9, %c0_10] : memref<1x32xf32, #tpu.memory_space<vmem>>, vector<1x32xf32>
    %10 = vector.broadcast %9 : vector<1x32xf32> to vector<16x32xf32>
    %11 = arith.addf %8, %10 : vector<16x32xf32>
    %12 = vector.shape_cast %6 : vector<16x32xf32> to vector<2x8x32xf32>
    %c0_11 = arith.constant 0 : index
    %c0_12 = arith.constant 0 : index
    %c0_13 = arith.constant 0 : index
    %13 = vector.load %arg5[%c0_11, %c0_12, %c0_13] : memref<2x8x32xf32, #tpu.memory_space<vmem>>, vector<2x8x32xf32>
    tpu.vector_store %arg5[%c0_11, %c0_12, %c0_13], %12 {strides = array<i32>} : memref<2x8x32xf32, #tpu.memory_space<vmem>>, vector<2x8x32xf32>,
    %14 = vector.shape_cast %11 : vector<16x32xf32> to vector<2x8x32xf32>
    %c0_14 = arith.constant 0 : index
    %c0_15 = arith.constant 0 : index
    %c0_16 = arith.constant 0 : index
    %15 = vector.load %arg6[%c0_14, %c0_15, %c0_16] : memref<2x8x32xf32, #tpu.memory_space<vmem>>, vector<2x8x32xf32>
    tpu.vector_store %arg6[%c0_14, %c0_15, %c0_16], %14 {strides = array<i32>} : memref<2x8x32xf32, #tpu.memory_space<vmem>>, vector<2x8x32xf32>,
    return
  }
}

module attributes {stable_mosaic.version = 11 : i64} {
  func.func @_decode_step_kernel(%arg0: memref<2x128xf32, #tpu.memory_space<vmem>>, %arg1: memref<2x32xf32, #tpu.memory_space<vmem>>, %arg2: memref<2x32xf32, #tpu.memory_space<vmem>>, %arg3: memref<2x8xf32, #tpu.memory_space<vmem>>, %arg4: memref<32x128xf32, #tpu.memory_space<vmem>>, %arg5: memref<2x8x32xf32, #tpu.memory_space<vmem>>, %arg6: memref<2x8x32xf32, #tpu.memory_space<vmem>>, %arg7: memref<32x32xf32, #tpu.memory_space<vmem>>, %arg8: memref<1x32xf32, #tpu.memory_space<vmem>>, %arg9: memref<1x32xf32, #tpu.memory_space<vmem>>, %arg10: memref<32x32xf32, #tpu.memory_space<vmem>>, %arg11: memref<1x32xf32, #tpu.memory_space<vmem>>, %arg12: memref<1x32xf32, #tpu.memory_space<vmem>>, %arg13: memref<2x32xf32, #tpu.memory_space<vmem>>, %arg14: memref<2x32xf32, #tpu.memory_space<vmem>>, %arg15: memref<2x8xf32, #tpu.memory_space<vmem>>, %arg16: memref<2x8xf32, #tpu.memory_space<vmem>>) attributes {dimension_semantics = [], scalar_prefetch = 0 : i64, scratch_operands = 0 : i64, tpu.core_type = #tpu.core_type<tc>} {
    %c0 = arith.constant 0 : index
    %c0_0 = arith.constant 0 : index
    %0 = vector.load %arg0[%c0, %c0_0] : memref<2x128xf32, #tpu.memory_space<vmem>>, vector<2x128xf32>
    %c0_1 = arith.constant 0 : index
    %c0_2 = arith.constant 0 : index
    %1 = vector.load %arg1[%c0_1, %c0_2] : memref<2x32xf32, #tpu.memory_space<vmem>>, vector<2x32xf32>
    %c0_3 = arith.constant 0 : index
    %c0_4 = arith.constant 0 : index
    %2 = vector.load %arg4[%c0_3, %c0_4] : memref<32x128xf32, #tpu.memory_space<vmem>>, vector<32x128xf32>
    %cst = arith.constant dense<0.000000e+00> : vector<2x128xf32>
    %3 = tpu.matmul %1, %2, %cst {dimension_numbers = #tpu.dot_dimension_numbers<[1], [0], [0], [1], [0, 0, 1, 1], [], []>} : vector<2x32xf32>, vector<32x128xf32>, vector<2x128xf32> -> vector<2x128xf32>
    %4 = arith.addf %0, %3 : vector<2x128xf32>
    %c0_5 = arith.constant 0 : index
    %c0_6 = arith.constant 0 : index
    %5 = vector.load %arg2[%c0_5, %c0_6] : memref<2x32xf32, #tpu.memory_space<vmem>>, vector<2x32xf32>
    %6 = vector.extract_strided_slice %4 {offsets = [0, 0], sizes = [2, 32], strides = [1, 1]} : vector<2x128xf32> to vector<2x32xf32>
    %7 = arith.negf %6 : vector<2x32xf32>
    %8 = math.exp %7 : vector<2x32xf32>
    %cst_7 = arith.constant 1.000000e+00 : f32
    %9 = vector.broadcast %cst_7 : f32 to vector<2x32xf32>
    %10 = arith.addf %9, %8 : vector<2x32xf32>
    %11 = arith.divf %9, %10 : vector<2x32xf32>
    %12 = vector.extract_strided_slice %4 {offsets = [0, 32], sizes = [2, 32], strides = [1, 1]} : vector<2x128xf32> to vector<2x32xf32>
    %13 = arith.negf %12 : vector<2x32xf32>
    %14 = math.exp %13 : vector<2x32xf32>
    %cst_8 = arith.constant 1.000000e+00 : f32
    %15 = vector.broadcast %cst_8 : f32 to vector<2x32xf32>
    %16 = arith.addf %15, %14 : vector<2x32xf32>
    %17 = arith.divf %15, %16 : vector<2x32xf32>
    %18 = vector.extract_strided_slice %4 {offsets = [0, 64], sizes = [2, 32], strides = [1, 1]} : vector<2x128xf32> to vector<2x32xf32>
    %19 = math.tanh %18 : vector<2x32xf32>
    %20 = vector.extract_strided_slice %4 {offsets = [0, 96], sizes = [2, 32], strides = [1, 1]} : vector<2x128xf32> to vector<2x32xf32>
    %21 = arith.negf %20 : vector<2x32xf32>
    %22 = math.exp %21 : vector<2x32xf32>
    %cst_9 = arith.constant 1.000000e+00 : f32
    %23 = vector.broadcast %cst_9 : f32 to vector<2x32xf32>
    %24 = arith.addf %23, %22 : vector<2x32xf32>
    %25 = arith.divf %23, %24 : vector<2x32xf32>
    %26 = arith.mulf %17, %5 : vector<2x32xf32>
    %27 = arith.mulf %11, %19 : vector<2x32xf32>
    %28 = arith.addf %26, %27 : vector<2x32xf32>
    %29 = math.tanh %28 : vector<2x32xf32>
    %30 = arith.mulf %25, %29 : vector<2x32xf32>
    %c0_10 = arith.constant 0 : index
    %c0_11 = arith.constant 0 : index
    %31 = vector.load %arg13[%c0_10, %c0_11] : memref<2x32xf32, #tpu.memory_space<vmem>>, vector<2x32xf32>
    tpu.vector_store %arg13[%c0_10, %c0_11], %30 {strides = array<i32>} : memref<2x32xf32, #tpu.memory_space<vmem>>, vector<2x32xf32>,
    %c0_12 = arith.constant 0 : index
    %c0_13 = arith.constant 0 : index
    %32 = vector.load %arg14[%c0_12, %c0_13] : memref<2x32xf32, #tpu.memory_space<vmem>>, vector<2x32xf32>
    tpu.vector_store %arg14[%c0_12, %c0_13], %28 {strides = array<i32>} : memref<2x32xf32, #tpu.memory_space<vmem>>, vector<2x32xf32>,
    %c0_14 = arith.constant 0 : index
    %c0_15 = arith.constant 0 : index
    %33 = vector.load %arg3[%c0_14, %c0_15] : memref<2x8xf32, #tpu.memory_space<vmem>>, vector<2x8xf32>
    %cst_16 = arith.constant 5.000000e-01 : f32
    %34 = vector.broadcast %cst_16 : f32 to vector<2x8xf32>
    %35 = arith.cmpf ogt, %33, %34 : vector<2x8xf32>
    %c0_17 = arith.constant 0 : index
    %c0_18 = arith.constant 0 : index
    %c0_19 = arith.constant 0 : index
    %36 = vector.load %arg5[%c0_17, %c0_18, %c0_19] : memref<2x8x32xf32, #tpu.memory_space<vmem>>, vector<2x8x32xf32>
    %c0_20 = arith.constant 0 : index
    %c0_21 = arith.constant 0 : index
    %c0_22 = arith.constant 0 : index
    %37 = vector.load %arg6[%c0_20, %c0_21, %c0_22] : memref<2x8x32xf32, #tpu.memory_space<vmem>>, vector<2x8x32xf32>
    %c0_23 = arith.constant 0 : index
    %c0_24 = arith.constant 0 : index
    %38 = vector.load %arg7[%c0_23, %c0_24] : memref<32x32xf32, #tpu.memory_space<vmem>>, vector<32x32xf32>
    %cst_25 = arith.constant dense<0.000000e+00> : vector<2x32xf32>
    %39 = tpu.matmul %30, %38, %cst_25 {dimension_numbers = #tpu.dot_dimension_numbers<[1], [0], [0], [1], [0, 0, 1, 1], [], []>} : vector<2x32xf32>, vector<32x32xf32>, vector<2x32xf32> -> vector<2x32xf32>
    %c0_26 = arith.constant 0 : index
    %c0_27 = arith.constant 0 : index
    %40 = vector.load %arg8[%c0_26, %c0_27] : memref<1x32xf32, #tpu.memory_space<vmem>>, vector<1x32xf32>
    %41 = vector.broadcast %40 : vector<1x32xf32> to vector<2x32xf32>
    %42 = arith.addf %39, %41 : vector<2x32xf32>
    %43 = vector.shape_cast %42 : vector<2x32xf32> to vector<2x1x32xf32>
    %44 = vector.broadcast %43 : vector<2x1x32xf32> to vector<2x8x32xf32>
    %45 = arith.addf %44, %36 : vector<2x8x32xf32>
    %46 = math.tanh %45 : vector<2x8x32xf32>
    %c0_28 = arith.constant 0 : index
    %c0_29 = arith.constant 0 : index
    %47 = vector.load %arg9[%c0_28, %c0_29] : memref<1x32xf32, #tpu.memory_space<vmem>>, vector<1x32xf32>
    %48 = vector.shape_cast %47 : vector<1x32xf32> to vector<1x1x32xf32>
    %49 = vector.broadcast %48 : vector<1x1x32xf32> to vector<2x8x32xf32>
    %50 = arith.mulf %46, %49 : vector<2x8x32xf32>
    %cst_30 = arith.constant dense<0.000000e+00> : vector<2x8xf32>
    %51 = vector.multi_reduction <add>, %50, %cst_30 [2] : vector<2x8x32xf32> to vector<2x8xf32>
    %cst_31 = arith.constant -1.000000e+30 : f32
    %52 = vector.broadcast %cst_31 : f32 to vector<2x8xf32>
    %53 = arith.select %35, %52, %51 : vector<2x8xi1>, vector<2x8xf32>
    %cst_32 = arith.constant dense<0xFF800000> : vector<2xf32>
    %54 = vector.multi_reduction <maximumf>, %53, %cst_32 [1] : vector<2x8xf32> to vector<2xf32>
    %55 = vector.shape_cast %54 : vector<2xf32> to vector<2x1xf32>
    %56 = vector.broadcast %55 : vector<2x1xf32> to vector<2x8xf32>
    %57 = arith.subf %53, %56 : vector<2x8xf32>
    %58 = math.exp %57 : vector<2x8xf32>
    %cst_33 = arith.constant dense<0.000000e+00> : vector<2xf32>
    %59 = vector.multi_reduction <add>, %58, %cst_33 [1] : vector<2x8xf32> to vector<2xf32>
    %60 = vector.shape_cast %59 : vector<2xf32> to vector<2x1xf32>
    %61 = vector.broadcast %60 : vector<2x1xf32> to vector<2x8xf32>
    %62 = arith.divf %58, %61 : vector<2x8xf32>
    %63 = vector.shape_cast %62 : vector<2x8xf32> to vector<2x8x1xf32>
    %64 = vector.broadcast %63 : vector<2x8x1xf32> to vector<2x8x32xf32>
    %65 = arith.mulf %36, %64 : vector<2x8x32xf32>
    %cst_34 = arith.constant dense<0.000000e+00> : vector<2x32xf32>
    %66 = vector.multi_reduction <add>, %65, %cst_34 [1] : vector<2x8x32xf32> to vector<2x32xf32>
    %c0_35 = arith.constant 0 : index
    %c0_36 = arith.constant 0 : index
    %67 = vector.load %arg10[%c0_35, %c0_36] : memref<32x32xf32, #tpu.memory_space<vmem>>, vector<32x32xf32>
    %cst_37 = arith.constant dense<0.000000e+00> : vector<2x32xf32>
    %68 = tpu.matmul %66, %67, %cst_37 {dimension_numbers = #tpu.dot_dimension_numbers<[1], [0], [0], [1], [0, 0, 1, 1], [], []>} : vector<2x32xf32>, vector<32x32xf32>, vector<2x32xf32> -> vector<2x32xf32>
    %c0_38 = arith.constant 0 : index
    %c0_39 = arith.constant 0 : index
    %69 = vector.load %arg11[%c0_38, %c0_39] : memref<1x32xf32, #tpu.memory_space<vmem>>, vector<1x32xf32>
    %70 = vector.broadcast %69 : vector<1x32xf32> to vector<2x32xf32>
    %71 = arith.addf %68, %70 : vector<2x32xf32>
    %72 = vector.shape_cast %71 : vector<2x32xf32> to vector<2x1x32xf32>
    %73 = vector.broadcast %72 : vector<2x1x32xf32> to vector<2x8x32xf32>
    %74 = arith.addf %73, %37 : vector<2x8x32xf32>
    %75 = math.tanh %74 : vector<2x8x32xf32>
    %c0_40 = arith.constant 0 : index
    %c0_41 = arith.constant 0 : index
    %76 = vector.load %arg12[%c0_40, %c0_41] : memref<1x32xf32, #tpu.memory_space<vmem>>, vector<1x32xf32>
    %77 = vector.shape_cast %76 : vector<1x32xf32> to vector<1x1x32xf32>
    %78 = vector.broadcast %77 : vector<1x1x32xf32> to vector<2x8x32xf32>
    %79 = arith.mulf %75, %78 : vector<2x8x32xf32>
    %cst_42 = arith.constant dense<0.000000e+00> : vector<2x8xf32>
    %80 = vector.multi_reduction <add>, %79, %cst_42 [2] : vector<2x8x32xf32> to vector<2x8xf32>
    %81 = math.tanh %80 : vector<2x8xf32>
    %cst_43 = arith.constant 1.000000e+01 : f32
    %82 = vector.broadcast %cst_43 : f32 to vector<2x8xf32>
    %83 = arith.mulf %82, %81 : vector<2x8xf32>
    %cst_44 = arith.constant -1.000000e+30 : f32
    %84 = vector.broadcast %cst_44 : f32 to vector<2x8xf32>
    %85 = arith.select %35, %84, %83 : vector<2x8xi1>, vector<2x8xf32>
    %c0_45 = arith.constant 0 : index
    %c0_46 = arith.constant 0 : index
    %86 = vector.load %arg16[%c0_45, %c0_46] : memref<2x8xf32, #tpu.memory_space<vmem>>, vector<2x8xf32>
    tpu.vector_store %arg16[%c0_45, %c0_46], %85 {strides = array<i32>} : memref<2x8xf32, #tpu.memory_space<vmem>>, vector<2x8xf32>,
    %cst_47 = arith.constant dense<0xFF800000> : vector<2xf32>
    %87 = vector.multi_reduction <maximumf>, %85, %cst_47 [1] : vector<2x8xf32> to vector<2xf32>
    %88 = vector.shape_cast %87 : vector<2xf32> to vector<2x1xf32>
    %89 = vector.broadcast %88 : vector<2x1xf32> to vector<2x8xf32>
    %90 = arith.subf %85, %89 : vector<2x8xf32>
    %91 = math.exp %90 : vector<2x8xf32>
    %cst_48 = arith.constant dense<0.000000e+00> : vector<2xf32>
    %92 = vector.multi_reduction <add>, %91, %cst_48 [1] : vector<2x8xf32> to vector<2xf32>
    %93 = vector.shape_cast %92 : vector<2xf32> to vector<2x1xf32>
    %94 = vector.broadcast %93 : vector<2x1xf32> to vector<2x8xf32>
    %95 = arith.divf %91, %94 : vector<2x8xf32>
    %c0_49 = arith.constant 0 : index
    %c0_50 = arith.constant 0 : index
    %96 = vector.load %arg15[%c0_49, %c0_50] : memref<2x8xf32, #tpu.memory_space<vmem>>, vector<2x8xf32>
    tpu.vector_store %arg15[%c0_49, %c0_50], %95 {strides = array<i32>} : memref<2x8xf32, #tpu.memory_space<vmem>>, vector<2x8xf32>,
    return
  }
}

module attributes {stable_mosaic.version = 11 : i64} {
  func.func @_decode_step_kernel(%arg0: memref<2x128xf32, #tpu.memory_space<vmem>>, %arg1: memref<2x32xf32, #tpu.memory_space<vmem>>, %arg2: memref<2x32xf32, #tpu.memory_space<vmem>>, %arg3: memref<2x8xf32, #tpu.memory_space<vmem>>, %arg4: memref<32x128xf32, #tpu.memory_space<vmem>>, %arg5: memref<2x8x32xf32, #tpu.memory_space<vmem>>, %arg6: memref<2x8x32xf32, #tpu.memory_space<vmem>>, %arg7: memref<32x32xf32, #tpu.memory_space<vmem>>, %arg8: memref<1x32xf32, #tpu.memory_space<vmem>>, %arg9: memref<1x32xf32, #tpu.memory_space<vmem>>, %arg10: memref<32x32xf32, #tpu.memory_space<vmem>>, %arg11: memref<1x32xf32, #tpu.memory_space<vmem>>, %arg12: memref<1x32xf32, #tpu.memory_space<vmem>>, %arg13: memref<2x32xf32, #tpu.memory_space<vmem>>, %arg14: memref<2x32xf32, #tpu.memory_space<vmem>>, %arg15: memref<2x8xf32, #tpu.memory_space<vmem>>, %arg16: memref<2x8xf32, #tpu.memory_space<vmem>>) attributes {dimension_semantics = [], scalar_prefetch = 0 : i64, scratch_operands = 0 : i64, tpu.core_type = #tpu.core_type<tc>} {
    %c0 = arith.constant 0 : index
    %c0_0 = arith.constant 0 : index
    %0 = vector.load %arg0[%c0, %c0_0] : memref<2x128xf32, #tpu.memory_space<vmem>>, vector<2x128xf32>
    %c0_1 = arith.constant 0 : index
    %c0_2 = arith.constant 0 : index
    %1 = vector.load %arg1[%c0_1, %c0_2] : memref<2x32xf32, #tpu.memory_space<vmem>>, vector<2x32xf32>
    %c0_3 = arith.constant 0 : index
    %c0_4 = arith.constant 0 : index
    %2 = vector.load %arg4[%c0_3, %c0_4] : memref<32x128xf32, #tpu.memory_space<vmem>>, vector<32x128xf32>
    %cst = arith.constant dense<0.000000e+00> : vector<2x128xf32>
    %3 = tpu.matmul %1, %2, %cst {dimension_numbers = #tpu.dot_dimension_numbers<[1], [0], [0], [1], [0, 0, 1, 1], [], []>} : vector<2x32xf32>, vector<32x128xf32>, vector<2x128xf32> -> vector<2x128xf32>
    %4 = arith.addf %0, %3 : vector<2x128xf32>
    %c0_5 = arith.constant 0 : index
    %c0_6 = arith.constant 0 : index
    %5 = vector.load %arg2[%c0_5, %c0_6] : memref<2x32xf32, #tpu.memory_space<vmem>>, vector<2x32xf32>
    %6 = vector.extract_strided_slice %4 {offsets = [0, 0], sizes = [2, 32], strides = [1, 1]} : vector<2x128xf32> to vector<2x32xf32>
    %7 = arith.negf %6 : vector<2x32xf32>
    %8 = math.exp %7 : vector<2x32xf32>
    %cst_7 = arith.constant 1.000000e+00 : f32
    %9 = vector.broadcast %cst_7 : f32 to vector<2x32xf32>
    %10 = arith.addf %9, %8 : vector<2x32xf32>
    %11 = arith.divf %9, %10 : vector<2x32xf32>
    %12 = vector.extract_strided_slice %4 {offsets = [0, 32], sizes = [2, 32], strides = [1, 1]} : vector<2x128xf32> to vector<2x32xf32>
    %13 = arith.negf %12 : vector<2x32xf32>
    %14 = math.exp %13 : vector<2x32xf32>
    %cst_8 = arith.constant 1.000000e+00 : f32
    %15 = vector.broadcast %cst_8 : f32 to vector<2x32xf32>
    %16 = arith.addf %15, %14 : vector<2x32xf32>
    %17 = arith.divf %15, %16 : vector<2x32xf32>
    %18 = vector.extract_strided_slice %4 {offsets = [0, 64], sizes = [2, 32], strides = [1, 1]} : vector<2x128xf32> to vector<2x32xf32>
    %19 = math.tanh %18 : vector<2x32xf32>
    %20 = vector.extract_strided_slice %4 {offsets = [0, 96], sizes = [2, 32], strides = [1, 1]} : vector<2x128xf32> to vector<2x32xf32>
    %21 = arith.negf %20 : vector<2x32xf32>
    %22 = math.exp %21 : vector<2x32xf32>
    %cst_9 = arith.constant 1.000000e+00 : f32
    %23 = vector.broadcast %cst_9 : f32 to vector<2x32xf32>
    %24 = arith.addf %23, %22 : vector<2x32xf32>
    %25 = arith.divf %23, %24 : vector<2x32xf32>
    %26 = arith.mulf %17, %5 : vector<2x32xf32>
    %27 = arith.mulf %11, %19 : vector<2x32xf32>
    %28 = arith.addf %26, %27 : vector<2x32xf32>
    %29 = math.tanh %28 : vector<2x32xf32>
    %30 = arith.mulf %25, %29 : vector<2x32xf32>
    %c0_10 = arith.constant 0 : index
    %c0_11 = arith.constant 0 : index
    %31 = vector.load %arg13[%c0_10, %c0_11] : memref<2x32xf32, #tpu.memory_space<vmem>>, vector<2x32xf32>
    tpu.vector_store %arg13[%c0_10, %c0_11], %30 {strides = array<i32>} : memref<2x32xf32, #tpu.memory_space<vmem>>, vector<2x32xf32>,
    %c0_12 = arith.constant 0 : index
    %c0_13 = arith.constant 0 : index
    %32 = vector.load %arg14[%c0_12, %c0_13] : memref<2x32xf32, #tpu.memory_space<vmem>>, vector<2x32xf32>
    tpu.vector_store %arg14[%c0_12, %c0_13], %28 {strides = array<i32>} : memref<2x32xf32, #tpu.memory_space<vmem>>, vector<2x32xf32>,
    %c0_14 = arith.constant 0 : index
    %c0_15 = arith.constant 0 : index
    %33 = vector.load %arg3[%c0_14, %c0_15] : memref<2x8xf32, #tpu.memory_space<vmem>>, vector<2x8xf32>
    %cst_16 = arith.constant 5.000000e-01 : f32
    %34 = vector.broadcast %cst_16 : f32 to vector<2x8xf32>
    %35 = arith.cmpf ogt, %33, %34 : vector<2x8xf32>
    %c0_17 = arith.constant 0 : index
    %c0_18 = arith.constant 0 : index
    %c0_19 = arith.constant 0 : index
    %36 = vector.load %arg5[%c0_17, %c0_18, %c0_19] : memref<2x8x32xf32, #tpu.memory_space<vmem>>, vector<2x8x32xf32>
    %c0_20 = arith.constant 0 : index
    %c0_21 = arith.constant 0 : index
    %c0_22 = arith.constant 0 : index
    %37 = vector.load %arg6[%c0_20, %c0_21, %c0_22] : memref<2x8x32xf32, #tpu.memory_space<vmem>>, vector<2x8x32xf32>
    %c0_23 = arith.constant 0 : index
    %c0_24 = arith.constant 0 : index
    %38 = vector.load %arg7[%c0_23, %c0_24] : memref<32x32xf32, #tpu.memory_space<vmem>>, vector<32x32xf32>
    %cst_25 = arith.constant dense<0.000000e+00> : vector<2x32xf32>
    %39 = tpu.matmul %30, %38, %cst_25 {dimension_numbers = #tpu.dot_dimension_numbers<[1], [0], [0], [1], [0, 0, 1, 1], [], []>} : vector<2x32xf32>, vector<32x32xf32>, vector<2x32xf32> -> vector<2x32xf32>
    %c0_26 = arith.constant 0 : index
    %c0_27 = arith.constant 0 : index
    %40 = vector.load %arg8[%c0_26, %c0_27] : memref<1x32xf32, #tpu.memory_space<vmem>>, vector<1x32xf32>
    %41 = vector.broadcast %40 : vector<1x32xf32> to vector<2x32xf32>
    %42 = arith.addf %39, %41 : vector<2x32xf32>
    %43 = vector.shape_cast %42 : vector<2x32xf32> to vector<2x1x32xf32>
    %44 = vector.broadcast %43 : vector<2x1x32xf32> to vector<2x8x32xf32>
    %45 = arith.addf %44, %36 : vector<2x8x32xf32>
    %46 = math.tanh %45 : vector<2x8x32xf32>
    %c0_28 = arith.constant 0 : index
    %c0_29 = arith.constant 0 : index
    %47 = vector.load %arg9[%c0_28, %c0_29] : memref<1x32xf32, #tpu.memory_space<vmem>>, vector<1x32xf32>
    %48 = vector.shape_cast %47 : vector<1x32xf32> to vector<1x1x32xf32>
    %49 = vector.broadcast %48 : vector<1x1x32xf32> to vector<2x8x32xf32>
    %50 = arith.mulf %46, %49 : vector<2x8x32xf32>
    %cst_30 = arith.constant dense<0.000000e+00> : vector<2x8xf32>
    %51 = vector.multi_reduction <add>, %50, %cst_30 [2] : vector<2x8x32xf32> to vector<2x8xf32>
    %cst_31 = arith.constant -1.000000e+30 : f32
    %52 = vector.broadcast %cst_31 : f32 to vector<2x8xf32>
    %53 = arith.select %35, %52, %51 : vector<2x8xi1>, vector<2x8xf32>
    %cst_32 = arith.constant dense<0xFF800000> : vector<2xf32>
    %54 = vector.multi_reduction <maximumf>, %53, %cst_32 [1] : vector<2x8xf32> to vector<2xf32>
    %55 = vector.shape_cast %54 : vector<2xf32> to vector<2x1xf32>
    %56 = vector.broadcast %55 : vector<2x1xf32> to vector<2x8xf32>
    %57 = arith.subf %53, %56 : vector<2x8xf32>
    %58 = math.exp %57 : vector<2x8xf32>
    %cst_33 = arith.constant dense<0.000000e+00> : vector<2xf32>
    %59 = vector.multi_reduction <add>, %58, %cst_33 [1] : vector<2x8xf32> to vector<2xf32>
    %60 = vector.shape_cast %59 : vector<2xf32> to vector<2x1xf32>
    %61 = vector.broadcast %60 : vector<2x1xf32> to vector<2x8xf32>
    %62 = arith.divf %58, %61 : vector<2x8xf32>
    %63 = vector.shape_cast %62 : vector<2x8xf32> to vector<2x8x1xf32>
    %64 = vector.broadcast %63 : vector<2x8x1xf32> to vector<2x8x32xf32>
    %65 = arith.mulf %36, %64 : vector<2x8x32xf32>
    %cst_34 = arith.constant dense<0.000000e+00> : vector<2x32xf32>
    %66 = vector.multi_reduction <add>, %65, %cst_34 [1] : vector<2x8x32xf32> to vector<2x32xf32>
    %c0_35 = arith.constant 0 : index
    %c0_36 = arith.constant 0 : index
    %67 = vector.load %arg10[%c0_35, %c0_36] : memref<32x32xf32, #tpu.memory_space<vmem>>, vector<32x32xf32>
    %cst_37 = arith.constant dense<0.000000e+00> : vector<2x32xf32>
    %68 = tpu.matmul %66, %67, %cst_37 {dimension_numbers = #tpu.dot_dimension_numbers<[1], [0], [0], [1], [0, 0, 1, 1], [], []>} : vector<2x32xf32>, vector<32x32xf32>, vector<2x32xf32> -> vector<2x32xf32>
    %c0_38 = arith.constant 0 : index
    %c0_39 = arith.constant 0 : index
    %69 = vector.load %arg11[%c0_38, %c0_39] : memref<1x32xf32, #tpu.memory_space<vmem>>, vector<1x32xf32>
    %70 = vector.broadcast %69 : vector<1x32xf32> to vector<2x32xf32>
    %71 = arith.addf %68, %70 : vector<2x32xf32>
    %72 = vector.shape_cast %71 : vector<2x32xf32> to vector<2x1x32xf32>
    %73 = vector.broadcast %72 : vector<2x1x32xf32> to vector<2x8x32xf32>
    %74 = arith.addf %73, %37 : vector<2x8x32xf32>
    %75 = math.tanh %74 : vector<2x8x32xf32>
    %c0_40 = arith.constant 0 : index
    %c0_41 = arith.constant 0 : index
    %76 = vector.load %arg12[%c0_40, %c0_41] : memref<1x32xf32, #tpu.memory_space<vmem>>, vector<1x32xf32>
    %77 = vector.shape_cast %76 : vector<1x32xf32> to vector<1x1x32xf32>
    %78 = vector.broadcast %77 : vector<1x1x32xf32> to vector<2x8x32xf32>
    %79 = arith.mulf %75, %78 : vector<2x8x32xf32>
    %cst_42 = arith.constant dense<0.000000e+00> : vector<2x8xf32>
    %80 = vector.multi_reduction <add>, %79, %cst_42 [2] : vector<2x8x32xf32> to vector<2x8xf32>
    %81 = math.tanh %80 : vector<2x8xf32>
    %cst_43 = arith.constant 1.000000e+01 : f32
    %82 = vector.broadcast %cst_43 : f32 to vector<2x8xf32>
    %83 = arith.mulf %82, %81 : vector<2x8xf32>
    %cst_44 = arith.constant -1.000000e+30 : f32
    %84 = vector.broadcast %cst_44 : f32 to vector<2x8xf32>
    %85 = arith.select %35, %84, %83 : vector<2x8xi1>, vector<2x8xf32>
    %c0_45 = arith.constant 0 : index
    %c0_46 = arith.constant 0 : index
    %86 = vector.load %arg16[%c0_45, %c0_46] : memref<2x8xf32, #tpu.memory_space<vmem>>, vector<2x8xf32>
    tpu.vector_store %arg16[%c0_45, %c0_46], %85 {strides = array<i32>} : memref<2x8xf32, #tpu.memory_space<vmem>>, vector<2x8xf32>,
    %cst_47 = arith.constant dense<0xFF800000> : vector<2xf32>
    %87 = vector.multi_reduction <maximumf>, %85, %cst_47 [1] : vector<2x8xf32> to vector<2xf32>
    %88 = vector.shape_cast %87 : vector<2xf32> to vector<2x1xf32>
    %89 = vector.broadcast %88 : vector<2x1xf32> to vector<2x8xf32>
    %90 = arith.subf %85, %89 : vector<2x8xf32>
    %91 = math.exp %90 : vector<2x8xf32>
    %cst_48 = arith.constant dense<0.000000e+00> : vector<2xf32>
    %92 = vector.multi_reduction <add>, %91, %cst_48 [1] : vector<2x8xf32> to vector<2xf32>
    %93 = vector.shape_cast %92 : vector<2xf32> to vector<2x1xf32>
    %94 = vector.broadcast %93 : vector<2x1xf32> to vector<2x8xf32>
    %95 = arith.divf %91, %94 : vector<2x8xf32>
    %c0_49 = arith.constant 0 : index
    %c0_50 = arith.constant 0 : index
    %96 = vector.load %arg15[%c0_49, %c0_50] : memref<2x8xf32, #tpu.memory_space<vmem>>, vector<2x8xf32>
    tpu.vector_store %arg15[%c0_49, %c0_50], %95 {strides = array<i32>} : memref<2x8xf32, #tpu.memory_space<vmem>>, vector<2x8xf32>,
    return
  }
}

</mosaic_0001>

<bundles_post_ra>
// kernel: _lambda_.14
= control target key start
LH: loop header
LB: loop body
LE: loop exit
PB: predicated region body
PF: predicated region fallthrough
CT: control target
= control target key end

     0   :  { %vm35_vm0 = vcmask 261120   ;;  %s362_s1 = inlined_call_operand.vmem [shape: f32[32,32], index: 1, kind: input, shape index: {}]   ;;  %s363_s3 = inlined_call_operand.vmem [shape: f32[32,32], index: 3, kind: input, shape index: {}]   ;;  %s364_s0 = inlined_call_operand.vmem [shape: f32[2,8,32], index: 0, kind: input, shape index: {}]   ;;  %s365_s2 = inlined_call_operand.vmem [shape: f32[1,32], index: 2, kind: input, shape index: {}]   ;;  %s366_s4 = inlined_call_operand.vmem [shape: f32[1,32], index: 4, kind: input, shape index: {}]   ;;  %s367_s5 = inlined_call_operand.vmem [shape: f32[2,8,32], index: 5, kind: output, shape index: {0}]   ;;  %s368_s6 = inlined_call_operand.vmem [shape: f32[2,8,32], index: 6, kind: output, shape index: {1}]  }
   0x1   :  { %v24_v0 = vld [vmem:[%s362_s1] sm:$0xff]  ;;  %v25_v1 = vld [vmem:[%s362_s1 + $0x8] sm:$0xff]  ;;  %v26_v5 = vld [vmem:[%s362_s1 + $0x10] sm:$0xff] }
   0x2   :  { %v117_v2 = vld [vmem:[%s363_s3] sm:$0xff]  ;;  %v255_v3 = vpack.c.bf16 %v25_v1, %v24_v0  ;;  %v118_v4 = vld [vmem:[%s363_s3 + $0x8] sm:$0xff]  ;;  %v27_v6 = vld [vmem:[%s362_s1 + $0x18] sm:$0xff] }
   0x3   :  { %v263_v7 = vpack.c.bf16 %v118_v4, %v117_v2  ;;  %v259_v8 = vpack.c.bf16 %v27_v6, %v26_v5  ;;  %v119_v9 = vld [vmem:[%s363_s3 + $0x10] sm:$0xff]  ;;  %v120_v10 = vld [vmem:[%s363_s3 + $0x18] sm:$0xff]  ;;  %v22_v11 = vld [vmem:[%s364_s0] sm:$0xff] }
   0x4   :  { %256 = vmatprep.subr.bf16.mxu0 %v255_v3  ;;  %v267_v12 = vpack.c.bf16 %v120_v10, %v119_v9  ;;  %241 = vmatprep.mubr.msk.f32.mxu0 %vm35_vm0, %v22_v11  ;;  %v23_v13 = vld [vmem:[%s364_s0 + $0x8] sm:$0xff]  ;;  %v215_v14 = vld [vmem:[%s365_s2] ss:$0 sm:$0xff] }
   0x5   :  { %264 = vmatprep.subr.bf16.mxu1 %v263_v7  ;;  %258 = vmatpush3.bf16.msra.mxu0 %v255_v3  ;;  %v218_v15 = vld [vmem:[%s366_s4] ss:$0 sm:$0xff] }
   0x6   :  { %266 = vmatpush3.bf16.msra.mxu1 %v263_v7  ;;  %260 = vmatprep.subr.bf16.mxu0 %v259_v8 }
   0x7   :  { %268 = vmatprep.subr.bf16.mxu1 %v267_v12  ;;  %252 = vmatprep.mubr.msk.f32.mxu1 %vm35_vm0, %v22_v11 }
   0x9   :  { %262 = vmatpush3.bf16.msra.mxu0 %v259_v8 }
   0xa   :  { %270 = vmatpush3.bf16.msra.mxu1 %v267_v12 }
   0xc   :  { %242 = vmatmul.mubr.msk.f32.vlgmr.msra.gmra.mrb[0].mxu0 %vm35_vm0, %v23_v13 }
   0xd   :  { %253 = vmatmul.mubr.msk.f32.vlgmr.msra.gmra.mrb[0].mxu1 %vm35_vm0, %v23_v13 }
  0xdf   :  { %v243_v16 = vpop.f32.mrb[0].mxu0 }
  0xe0   :  { %v114_v17 = vadd.f32 %v243_v16, %v215_v14  ;;  %v254_v18 = vpop.f32.mrb[0].mxu1  ;;  %v108_v19 = vpop.f32.mrb[1].mxu0 }
  0xe1   :  { %v200_v20 = vadd.f32 %v254_v18, %v218_v15  ;;  %v109_v21 = vadd.f32 %v215_v14, %v108_v19  ;;  %v194_v22 = vpop.f32.mrb[1].mxu1 }
  0xe2   :  { %204 = vst.msk [vmem:[%s367_s5 + $0x8] sm:$0xff] %vm35_vm0, %v114_v17  ;;  %v195_v23 = vadd.f32 %v218_v15, %v194_v22 }
  0xe3   :  { %206 = vst.msk [vmem:[%s368_s6 + $0x8] sm:$0xff] %vm35_vm0, %v200_v20  ;;  %203 = vst.msk [vmem:[%s367_s5] sm:$0xff] %vm35_vm0, %v109_v21 }
  0xe4   :  { %205 = vst.msk [vmem:[%s368_s6] sm:$0xff] %vm35_vm0, %v195_v23 }

// kernel: _lambda_.13
= control target key start
LH: loop header
LB: loop body
LE: loop exit
PB: predicated region body
PF: predicated region fallthrough
CT: control target
= control target key end

     0   :  { %s481_s15 = smov 0   ;;  %s519_s0 = inlined_call_operand.vmem [shape: f32[8,2,128], index: 0, kind: input, shape index: {}]   ;;  %s520_s1 = inlined_call_operand.vmem [shape: f32[32,128], index: 1, kind: input, shape index: {}]   ;;  %s521_s2 = inlined_call_operand.vmem [shape: f32[8,2,32], index: 2, kind: output, shape index: {0}]   ;;  %s522_s3 = inlined_call_operand.vmem [shape: f32[2,32], index: 3, kind: output, shape index: {1}]   ;;  %s523_s4 = inlined_call_operand.vmem [shape: f32[2,32], index: 4, kind: output, shape index: {2}]  }
   0x1 LB: > { %s384_s16 = sadd.s32 4294967295, %s447_s15   ;;  %p388_p0 = scmp.ge.s32.totalorder %s447_s15, 1  ;;  %s447_s15 = sphi %s481_s15, %s15_s15  }
   0x2   : > { %p156_p1 = scmp.lt.s32.totalorder %s447_s15, 9 }
   0x4   : > { %p157_p2 = pnand %p388_p0, %p156_p1 }
   0x5   : > { %p180_p3 = scmp.lt.s32.totalorder (!%p157_p2), %s384_s16, 7  ;;  %p391_p4 = scmp.ne.s32.totalorder (!%p157_p2), %s384_s16, 0 }
   0x6   : > { %160 = sbr.rel (%p157_p2) target bundleno = 735 (0x2df), region = 28 }
   0xd   : > { %s181_s17 = scalar_select %p180_p3, %s384_s16, 7 }
   0xe   : > { %191 = sbr.rel (%p391_p4) target bundleno = 21 (0x15), region = 32  ;;  %vm192_vm0 = vcmask (!%p391_p4), 254976   ;;  %v449_v0 = vmov (!%p391_p4), 0.0  }
   0xf   : > { %s389_s18 = sshll.u32 %s181_s17, 1  ;;  %193 = vst.msk [vmem:[#allocation2] sm:$0x3] (!%p391_p4), %vm192_vm0, %v449_v0  ;;  %194 = vst.msk [vmem:[#allocation3] sm:$0x3] (!%p391_p4), %vm192_vm0, %v449_v0 }
  0x10   : > { %s183_s21 = scalar_lea.vmem %s519_s0, %s389_s18  ;;  %s495_s24 = scalar_lea.vmem %s521_s2, %s389_s18 }
  0x15 PF: > { %v197_v1 = vld [vmem:[%s520_s1] sm:$0xff]  ;;  %v198_v2 = vld [vmem:[%s520_s1 + $0x8] sm:$0xff]  ;;  %v199_v3 = vld [vmem:[%s520_s1 + $0x10] sm:$0xff]  ;;  %v450_v4 = vmov 0.0|0.0   ;;  %vm451_vm1 = vmmov 0   ;;  %v452_v7 = vmov 0.0  }
  0x16   : > { %412 = vmatprep.subr.bf16.mxu0 %v450_v4  ;;  %v413_v5 = vpack.c.bf16 %v198_v2, %v197_v1  ;;  %v200_v6 = vld [vmem:[%s520_s1 + $0x18] sm:$0xff]  ;;  %409 = vmatprep.mubr.msk.f32.mxu0 %vm451_vm1, %v452_v7  ;;  %v196_v9 = vld [vmem:[#allocation2] sm:$0x3]  ;;  %vm201_vm2 = vcmask 261120   ;;  %s453_s7 = smov 64   ;;  %s454_s8 = smov 32  }
  0x17   : > { %v416_v8 = vpack.c.bf16 %v200_v6, %v199_v3  ;;  %v195_v10 = vld [vmem:[%s183_s21] sm:$0x3]  ;;  %v276_v15 = vld [vmem:[#allocation3] sm:$0x3]  ;;  %s455_s9 = smov 96   ;;  %vm309_vm3 = vcmask 254976  }
  0x18   : > { %414 = vmatpush3.bf16.msra.mxu0 %v413_v5 }
  0x19   : > { %415 = vmatprep.subr.bf16.mxu0 %v450_v4 }
  0x1c   : > { %417 = vmatpush3.bf16.msra.mxu0 %v416_v8 }
  0x1f   : > { %410 = vmatmul.mubr.msk.f32.vlgmr.msra.gmra.mrb[0].mxu0 %vm201_vm2, %v196_v9 }
  0xf2   : > { %v271_v11 = vpop.f32.mrb[0].mxu0 }
  0xf3   : > { %v275_v12 = vadd.f32 %v271_v11, %v195_v10  ;;  %v411_v13 = vpop.f32.mrb[1].mxu0 }
  0xf5   : > { %433 = vtanh.f32 %v275_v12  ;;  %v393_v16 = vmul.f32 -1.442695, %v275_v12 }
  0xf7   : > { %435 = vpow2.f32 %v393_v16 }
  0xff   : > { %v434_v14 = vpop.eup %433 }
 0x100   : > { %290 = vrot.lane.b32.xlu0 %v434_v14, %s453_s7 }
 0x101   : > { %v436_v17 = vpop.eup %435 }
 0x102   : > { %v280_v18 = vadd.f32 1.0, %v436_v17 }
 0x104   : > { %285 = vrot.lane.b32.xlu0 %v276_v15, %s454_s8  ;;  %437 = vrcp.f32 %v280_v18 }
 0x10e   : > { %v438_v19 = vpop.eup %437 }
 0x172   : > { %v291_v20 = vpop.permute.xlu0 %290 }
 0x173   : > { %v293_v21 = vmul.f32 %v438_v19, %v291_v20 }
 0x175   : > { %295 = vrot.lane.b32.xlu1 %v293_v21, %s454_s8 }
 0x176   : > { %v286_v22 = vpop.permute.xlu0 %285 }
 0x177   : > { %v288_v23 = vmul.f32 %v438_v19, %v286_v22 }
 0x1e7   : > { %v296_v24 = vpop.permute.xlu1 %295 }
 0x1e8   : > { %v298_v25 = vadd.f32 %v296_v24, %v288_v23 }
 0x1ea   : > { %439 = vtanh.f32 %v298_v25 }
 0x1f4   : > { %v440_v26 = vpop.eup %439 }
 0x1f5   : > { %301 = vrot.lane.b32.xlu1 %v440_v26, %s453_s7 }
 0x1f9   : > { %312 = vrot.lane.b32.xlu1 %v298_v25, %s455_s9 }
 0x267   : > { %v302_v27 = vpop.permute.xlu1 %301 }
 0x268   : > { %v304_v28 = vmul.f32 %v438_v19, %v302_v27 }
 0x26a   : > { %306 = vrot.lane.b32.xlu0 %v304_v28, %s454_s8 }
 0x26b   : > { %v313_v29 = vpop.permute.xlu1 %312 }
 0x26c   : > { %315 = vst.msk [vmem:[#allocation3] sm:$0x3] %vm309_vm3, %v313_v29  ;;  %318 = vst.msk [vmem:[%s523_s4] sm:$0x3] %vm309_vm3, %v313_v29 }
 0x2dc   : > { %v307_v30 = vpop.permute.xlu0 %306 }
 0x2dd   : > { %310 = vst.msk [vmem:[#allocation2] sm:$0x3] %vm309_vm3, %v307_v30  ;;  %316 = vst.msk [vmem:[%s495_s24] sm:$0x3] %vm309_vm3, %v307_v30 }
 0x2de   : > { %317 = vst.msk [vmem:[%s522_s3] sm:$0x3] %vm309_vm3, %v307_v30 }
 0x2df PF: > { %s15_s15 = sadd.s32 1, %s447_s15  }
 0x2e0   : > { %p12_p5 = scmp.ge.s32.totalorder %s15_s15, 10  }
 0x2e2   :  { %14 = sbr.rel (!%p12_p5) target bundleno = 1 (0x1), region = 78 }

// kernel: _lambda_.12
= control target key start
LH: loop header
LB: loop body
LE: loop exit
PB: predicated region body
PF: predicated region fallthrough
CT: control target
= control target key end

     0   :  { %v431_v0 = vmov 0   ;;  %v432_v14 = vmov 1   ;;  %v433_v16 = vmov 0.0|0.0   ;;  %v42_v17 = vlaneseq  ;;  %s546_s0 = inlined_call_operand.vmem [shape: f32[2,8,2], index: 0, kind: input, shape index: {}]   ;;  %s547_s2 = inlined_call_operand.vmem [shape: f32[32,128], index: 2, kind: input, shape index: {}]   ;;  %s548_s4 = inlined_call_operand.vmem [shape: f32[32,128], index: 4, kind: input, shape index: {}]   ;;  %s549_s1 = inlined_call_operand.vmem [shape: f32[2,32], index: 1, kind: input, shape index: {}]   ;;  %s550_s6 = inlined_call_operand.vmem [shape: f32[1,32], index: 6, kind: input, shape index: {}]   ;;  %s551_s3 = inlined_call_operand.vmem [shape: f32[1,128], index: 3, kind: input, shape index: {}]   ;;  %s552_s5 = inlined_call_operand.vmem [shape: f32[1,128], index: 5, kind: input, shape index: {}]   ;;  %s553_s7 = inlined_call_operand.vmem [shape: f32[2,8,128], index: 7, kind: output, shape index: {0}]   ;;  %s554_s8 = inlined_call_operand.vmem [shape: f32[2,8,128], index: 8, kind: output, shape index: {1}]   ;;  %s555_s9 = inlined_call_operand.vmem [shape: f32[2,128], index: 9, kind: output, shape index: {2}]  }
   0x1   :  { %429 = vset.pattern.permute.xlu1 %v431_v0  ;;  %427 = vset.pattern.permute.xlu0 %v431_v0  ;;  %v30_v1 = vld [vmem:[%s546_s0 + $0x8] sm:$0xff]  ;;  %v29_v2 = vld [vmem:[%s546_s0] sm:$0xff]  ;;  %v66_v9 = vld [vmem:[%s547_s2 + $0x10] sm:$0xff]  ;;  %vm75_vm0 = vcmask 261120   ;;  %vm434_vm1 = vmmov 0   ;;  %v435_v34 = vmov 0.0  }
   0x2   :  { %39 = vperm.xlu1 %429, %v30_v1   ;;  %34 = vperm.xlu0 %427, %v29_v2   ;;  %v64_v3 = vld [vmem:[%s547_s2] sm:$0xff]  ;;  %v65_v4 = vld [vmem:[%s547_s2 + $0x8] sm:$0xff]  ;;  %v67_v10 = vld [vmem:[%s547_s2 + $0x18] sm:$0xff]  ;;  %v43_v18 = vshrl.u32 %v42_v17, 7 }
   0x3   :  { %v159_v5 = vld [vmem:[%s548_s4] sm:$0xff]  ;;  %v400_v6 = vpack.c.bf16 %v65_v4, %v64_v3  ;;  %v160_v7 = vld [vmem:[%s548_s4 + $0x8] sm:$0xff]  ;;  %v404_v11 = vpack.c.bf16 %v67_v10, %v66_v9  ;;  %v161_v12 = vld [vmem:[%s548_s4 + $0x10] sm:$0xff] }
   0x4   :  { %v408_v8 = vpack.c.bf16 %v160_v7, %v159_v5  ;;  %v162_v13 = vld [vmem:[%s548_s4 + $0x18] sm:$0xff]  ;;  %v44_v19 = vsub.s32 0, %v43_v18  ;;  %v58_v20 = vsub.s32 1, %v43_v18  ;;  %v31_v21 = vld [vmem:[%s549_s1] sm:$0x3] }
   0x5   :  { %401 = vmatprep.subr.bf16.mxu0 %v400_v6  ;;  %v412_v15 = vpack.c.bf16 %v162_v13, %v161_v12  ;;  %v247_v35 = vld [vmem:[%s550_s6] sm:$0x1] }
   0x6   :  { %430 = vset.pattern.permute.xlu1 %v432_v14  ;;  %428 = vset.pattern.permute.xlu0 %v432_v14  ;;  %v45_v24 = vrot.slane %v31_v21, %v44_v19  ;;  %v59_v25 = vrot.slane %v31_v21, %v58_v20  ;;  %v343_v36 = vld [vmem:[%s551_s3] ss:$0 sm:$0xff] }
   0x7   :  { %53 = vperm.xlu1 %430, %v30_v1   ;;  %49 = vperm.xlu0 %428, %v29_v2   ;;  %v346_v37 = vld [vmem:[%s552_s5] ss:$0 sm:$0xff] }
   0x8   :  { %403 = vmatpush3.bf16.msra.mxu0 %v400_v6  ;;  %409 = vmatprep.subr.bf16.mxu1 %v408_v8  ;;  %v252_v46 = vld [vmem:[%s552_s5] sm:$0x1] }
   0x9   :  { %411 = vmatpush3.bf16.msra.mxu1 %v408_v8  ;;  %405 = vmatprep.subr.bf16.mxu0 %v404_v11 }
   0xa   :  { %413 = vmatprep.subr.bf16.mxu1 %v412_v15 }
   0xc   :  { %407 = vmatpush3.bf16.msra.mxu0 %v404_v11 }
   0xd   :  { %415 = vmatpush3.bf16.msra.mxu1 %v412_v15  ;;  %416 = vmatprep.subr.bf16.mxu0 %v433_v16 }
  0x81   :  { %v35_v22 = vpop.permute.xlu0 %34  ;;  %v40_v23 = vpop.permute.xlu1 %39 }
  0x82   :  { %v46_v28 = vmul.f32 %v45_v24, %v35_v22  ;;  %v47_v29 = vmul.f32 %v45_v24, %v40_v23 }
  0x86   :  { %v54_v26 = vpop.permute.xlu1 %53  ;;  %v50_v27 = vpop.permute.xlu0 %49 }
  0x87   :  { %v61_v30 = vmul.f32 %v59_v25, %v54_v26  ;;  %v60_v31 = vmul.f32 %v59_v25, %v50_v27 }
  0x89   :  { %v63_v32 = vadd.f32 %v61_v30, %v47_v29  ;;  %v62_v33 = vadd.f32 %v60_v31, %v46_v28 }
  0x8b   :  { %375 = vmatprep.mubr.msk.f32.mxu0 %vm75_vm0, %v62_v33  ;;  %386 = vmatprep.mubr.msk.f32.mxu1 %vm75_vm0, %v62_v33 }
  0x8c   :  { %376 = vmatmul.mubr.msk.f32.vlgmr.msra.gmra.mrb[0].mxu0 %vm75_vm0, %v63_v32  ;;  %387 = vmatmul.mubr.msk.f32.vlgmr.msra.gmra.mrb[0].mxu1 %vm75_vm0, %v63_v32 }
  0x8d   :  { %418 = vmatpush3.bf16.msra.mxu0 %v408_v8  ;;  %397 = vmatprep.mubr.msk.f32.mxu0 %vm434_vm1, %v435_v34 }
  0x8e   :  { %419 = vmatprep.subr.bf16.mxu0 %v433_v16 }
  0x91   :  { %421 = vmatpush3.bf16.msra.mxu0 %v412_v15 }
  0x94   :  { %398 = vmatmul.mubr.msk.f32.vlgmr.msra.gmra.mrb[2].mxu0 %vm75_vm0, %v247_v35 }
 0x15f   :  { %v377_v38 = vpop.f32.mrb[0].mxu0  ;;  %v388_v39 = vpop.f32.mrb[0].mxu1 }
 0x160   :  { %v154_v40 = vadd.f32 %v377_v38, %v343_v36  ;;  %v242_v41 = vadd.f32 %v388_v39, %v346_v37  ;;  %v148_v42 = vpop.f32.mrb[1].mxu0  ;;  %v236_v43 = vpop.f32.mrb[1].mxu1 }
 0x161   :  { %v149_v44 = vadd.f32 %v343_v36, %v148_v42  ;;  %v237_v45 = vadd.f32 %v346_v37, %v236_v43 }
 0x162   :  { %158 = vst [vmem:[%s553_s7 + $0x8] sm:$0xff] %v154_v40  ;;  %246 = vst [vmem:[%s554_s8 + $0x8] sm:$0xff] %v242_v41 }
 0x163   :  { %157 = vst [vmem:[%s553_s7] sm:$0xff] %v149_v44  ;;  %245 = vst [vmem:[%s554_s8] sm:$0xff] %v237_v45 }
 0x167   :  { %v322_v47 = vpop.f32.mrb[2].mxu0 }
 0x168   :  { %v323_v48 = vadd.f32 %v322_v47, %v252_v46  ;;  %v399_v49 = vpop.f32.mrb[3].mxu0 }
 0x16a   :  { %v329_v50 = vrot.slane %v323_v48, %v44_v19 }
 0x16c   :  { %330 = vst [vmem:[%s555_s9] sm:$0x3] %v329_v50 }

// kernel: _lambda_.15
= control target key start
LH: loop header
LB: loop body
LE: loop exit
PB: predicated region body
PF: predicated region fallthrough
CT: control target
= control target key end

     0   :  { %v661_v0 = vmov 0.0|0.0   ;;  %vm662_vm0 = vmmov 0   ;;  %v663_v4 = vmov 0.0   ;;  %vm54_vm1 = vcmask 261120   ;;  %s664_s19 = smov 64   ;;  %s665_s21 = smov 32   ;;  %s908_s4 = inlined_call_operand.vmem [shape: f32[32,128], index: 4, kind: input, shape index: {}]   ;;  %s909_s1 = inlined_call_operand.vmem [shape: f32[2,32], index: 1, kind: input, shape index: {}]   ;;  %s910_s0 = inlined_call_operand.vmem [shape: f32[2,128], index: 0, kind: input, shape index: {}]   ;;  %s911_s2 = inlined_call_operand.vmem [shape: f32[2,32], index: 2, kind: input, shape index: {}]   ;;  %s912_s7 = inlined_call_operand.vmem [shape: f32[32,32], index: 7, kind: input, shape index: {}]   ;;  %s913_s13 = inlined_call_operand.vmem [shape: f32[2,32], index: 13, kind: output, shape index: {0}]   ;;  %s914_s8 = inlined_call_operand.vmem [shape: f32[1,32], index: 8, kind: input, shape index: {}]   ;;  %s915_s5 = inlined_call_operand.vmem [shape: f32[2,8,32], index: 5, kind: input, shape index: {}]   ;;  %s916_s9 = inlined_call_operand.vmem [shape: f32[1,32], index: 9, kind: input, shape index: {}]   ;;  %s917_s3 = inlined_call_operand.vmem [shape: f32[2,8], index: 3, kind: input, shape index: {}]   ;;  %s918_s10 = inlined_call_operand.vmem [shape: f32[32,32], index: 10, kind: input, shape index: {}]   ;;  %s919_s11 = inlined_call_operand.vmem [shape: f32[1,32], index: 11, kind: input, shape index: {}]   ;;  %s920_s6 = inlined_call_operand.vmem [shape: f32[2,8,32], index: 6, kind: input, shape index: {}]   ;;  %s921_s12 = inlined_call_operand.vmem [shape: f32[1,32], index: 12, kind: input, shape index: {}]   ;;  %s922_s16 = inlined_call_operand.vmem [shape: f32[2,8], index: 16, kind: output, shape index: {3}]   ;;  %s923_s14 = inlined_call_operand.vmem [shape: f32[2,32], index: 14, kind: output, shape index: {1}]   ;;  %s924_s15 = inlined_call_operand.vmem [shape: f32[2,8], index: 15, kind: output, shape index: {2}]  }
   0x1   :  { %926 = sst [smem:[#allocation2_spill]] %s908_s4  ;;  %608 = vmatprep.subr.bf16.mxu0 %v661_v0  ;;  %583 = vmatprep.mubr.msk.f32.mxu0 %vm662_vm0, %v663_v4  ;;  %v49_v8 = vld [vmem:[%s909_s1] sm:$0x3]  ;;  %v176_v26 = vld [vmem:[%s912_s7 + $0x8] sm:$0xff]  ;;  %v177_v27 = vld [vmem:[%s912_s7 + $0x10] sm:$0xff]  ;;  %vm162_vm2 = vcmask 254976   ;;  %v262_v37 = vlaneseq }
   0x2   :  { %s927_s23 = sld [smem:[#allocation2_spill]]  ;;  %614 = vmatprep.subr.bf16.mxu1 %v661_v0  ;;  %594 = vmatprep.mubr.msk.f32.mxu1 %vm662_vm0, %v663_v4  ;;  %v48_v9 = vld [vmem:[%s910_s0] sm:$0x3]  ;;  %v178_v29 = vld [vmem:[%s912_s7 + $0x18] sm:$0xff]  ;;  %v666_v35 = vmov 1966171168  }
   0x3   :  { %v129_v14 = vld [vmem:[%s911_s2] sm:$0x3]  ;;  %v618_v30 = vpack.c.bf16 %v178_v29, %v177_v27  ;;  %v260_v36 = vunpack.c.l.s4 %v666_v35  ;;  %v803_v39 = vshrl.u32 %v262_v37, 7  ;;  %v172_v52 = vld [vmem:[%s915_s5 + $0x8] sm:$0xff]  ;;  %v313_v63 = vand.u32 127, %v262_v37 }
   0x4   :  { %v175_v25 = vld [vmem:[%s912_s7] sm:$0xff]  ;;  %vm322_vm3 = vcmask 1041409   ;;  %vm326_vm5 = vcmask 58368   ;;  %s667_s7 = smov 96  }
   0x5   :  { %v615_v28 = vpack.c.bf16 %v176_v26, %v175_v25  ;;  %v261_v38 = vunpack.c.0.s8 %v260_v36  ;;  %v554_v40 = vld [vmem:[%s914_s8] ss:$0 sm:$0xff]  ;;  %v813_v46 = vsub.s32 0, %v803_v39 }
   0x6   :  { %v819_v49 = vld [vmem:[%s915_s5] sm:$0xff] }
   0x7   :  { %616 = vmatpush3.bf16.msra.mxu1 %v615_v28  ;;  %v809_v41 = vsub.s32 %v261_v38, %v803_v39  ;;  %v556_v56 = vld [vmem:[%s916_s9] ss:$0 sm:$0xff] }
   0x8   :  { %v50_v1 = vld [vmem:[%s927_s23] sm:$0xff]  ;;  %v51_v2 = vld [vmem:[%s927_s23 + $0x8] sm:$0xff]  ;;  %v52_v3 = vld [vmem:[%s927_s23 + $0x10] sm:$0xff]  ;;  %617 = vmatprep.subr.bf16.mxu1 %v661_v0 }
   0x9   :  { %v609_v5 = vpack.c.bf16 %v51_v2, %v50_v1  ;;  %v53_v6 = vld [vmem:[%s927_s23 + $0x18] sm:$0xff]  ;;  %v834_v1 = vsub.s32 %v313_v63, %v803_v39 }
   0xa   :  { %v612_v7 = vpack.c.bf16 %v53_v6, %v52_v3  ;;  %v839_v3 = vld [vmem:[%s917_s3] sm:$0x3] }
   0xb   :  { %610 = vmatpush3.bf16.msra.mxu0 %v609_v5  ;;  %619 = vmatpush3.bf16.msra.mxu1 %v618_v30  ;;  %vm170_vm4 = vcmp.gt.f32.partialorder %v839_v3, 0.5 }
   0xc   :  { %611 = vmatprep.subr.bf16.mxu0 %v661_v0 }
   0xf   :  { %613 = vmatpush3.bf16.msra.mxu0 %v612_v7 }
  0x10   :  { %620 = vmatprep.subr.bf16.mxu0 %v661_v0 }
  0x12   :  { %584 = vmatmul.mubr.msk.f32.vlgmr.msra.gmra.mrb[0].mxu0 %vm54_vm1, %v49_v8 }
  0x13   :  { %605 = vmatprep.mubr.msk.f32.mxu0 %vm662_vm0, %v663_v4 }
  0xe5   :  { %v124_v10 = vpop.f32.mrb[0].mxu0 }
  0xe6   :  { %v128_v11 = vadd.f32 %v124_v10, %v48_v9  ;;  %v585_v12 = vpop.f32.mrb[1].mxu0 }
  0xe8   :  { %633 = vtanh.f32 %v128_v11  ;;  %v553_v15 = vmul.f32 -1.442695, %v128_v11 }
  0xea   :  { %635 = vpow2.f32 %v553_v15 }
  0xf2   :  { %v634_v13 = vpop.eup %633 }
  0xf3   :  { %143 = vrot.lane.b32.xlu0 %v634_v13, %s664_s19 }
  0xf4   :  { %v636_v16 = vpop.eup %635 }
  0xf5   :  { %v133_v17 = vadd.f32 1.0, %v636_v16  ;;  %v368_v16 = vld [vmem:[%s918_s10] sm:$0xff] }
  0xf7   :  { %138 = vrot.lane.b32.xlu0 %v129_v14, %s665_s21  ;;  %637 = vrcp.f32 %v133_v17  ;;  %v369_v17 = vld [vmem:[%s918_s10 + $0x8] sm:$0xff] }
 0x101   :  { %v638_v18 = vpop.eup %637 }
 0x165   :  { %v144_v19 = vpop.permute.xlu0 %143 }
 0x166   :  { %v146_v20 = vmul.f32 %v638_v18, %v144_v19  ;;  %v621_v19 = vpack.c.bf16 %v369_v17, %v368_v16 }
 0x168   :  { %148 = vrot.lane.b32.xlu1 %v146_v20, %s665_s21  ;;  %622 = vmatpush3.bf16.msra.mxu0 %v621_v19 }
 0x169   :  { %v139_v21 = vpop.permute.xlu0 %138  ;;  %623 = vmatprep.subr.bf16.mxu0 %v661_v0 }
 0x16a   :  { %v141_v22 = vmul.f32 %v638_v18, %v139_v21 }
 0x1da   :  { %v149_v23 = vpop.permute.xlu1 %148 }
 0x1db   :  { %v782_v24 = vadd.f32 %v149_v23, %v141_v22  ;;  %v370_v22 = vld [vmem:[%s918_s10 + $0x10] sm:$0xff]  ;;  %v371_v23 = vld [vmem:[%s918_s10 + $0x18] sm:$0xff] }
 0x1dc   :  { %v624_v27 = vpack.c.bf16 %v371_v23, %v370_v22 }
 0x1dd   :  { %639 = vtanh.f32 %v782_v24 }
 0x1de   :  { %625 = vmatpush3.bf16.msra.mxu0 %v624_v27 }
 0x1e7   :  { %v640_v31 = vpop.eup %639 }
 0x1e8   :  { %154 = vrot.lane.b32.xlu1 %v640_v31, %s664_s19 }
 0x25a   :  { %v155_v32 = vpop.permute.xlu1 %154 }
 0x25b   :  { %v157_v33 = vmul.f32 %v638_v18, %v155_v32  ;;  %v347_v18 = vsub.s32 1, %v803_v39 }
 0x25d   :  { %159 = vrot.lane.b32.xlu0 %v157_v33, %s665_s21 }
 0x2cf   :  { %v160_v34 = vpop.permute.xlu0 %159 }
 0x2d0   :  { %163 = vst.msk [vmem:[%s913_s13] sm:$0x3] %vm162_vm2, %v160_v34  ;;  %595 = vmatmul.mubr.msk.f32.vlgmr.msra.gmra.mrb[0].mxu1 %vm54_vm1, %v160_v34 }
 0x3a3   :  { %v254_v42 = vpop.f32.mrb[0].mxu1 }
 0x3a4   :  { %v255_v43 = vadd.f32 %v554_v40, %v254_v42  ;;  %v596_v44 = vpop.f32.mrb[1].mxu1 }
 0x3a6   :  { %v265_v45 = vrot.slane %v255_v43, %v809_v41 }
 0x3a8   :  { %v266_v47 = vcombine.high %v265_v45, %v265_v45  ;;  %v273_v48 = vrot.slane %v265_v45, %v809_v41 }
 0x3aa   :  { %v280_v50 = vrot.slane %v266_v47, %v809_v41  ;;  %v284_v51 = vrot.slane %v273_v48, %v813_v46  ;;  %v557_v48 = vld [vmem:[%s919_s11] ss:$0 sm:$0xff] }
 0x3ac   :  { %v288_v53 = vrot.slane %v280_v50, %v813_v46  ;;  %v291_v54 = vadd.f32 %v284_v51, %v819_v49 }
 0x3ae   :  { %v292_v55 = vadd.f32 %v288_v53, %v172_v52  ;;  %641 = vtanh.f32 %v291_v54 }
 0x3b0   :  { %643 = vtanh.f32 %v292_v55  ;;  %v173_v55 = vld [vmem:[%s920_s6] sm:$0xff] }
 0x3b8   :  { %v642_v57 = vpop.eup %641 }
 0x3b9   :  { %v302_v58 = vmul.f32 %v642_v57, %v556_v56 }
 0x3ba   :  { %v644_v59 = vpop.eup %643 }
 0x3bb   :  { %v304_v60 = vsel %vm54_vm1, %v302_v58, 0.0  ;;  %v303_v61 = vmul.f32 %v644_v59, %v556_v56  ;;  %v174_v58 = vld [vmem:[%s920_s6 + $0x8] sm:$0xff] }
 0x3bc   :  { %305 = vadd.xlane.f32.xlu1 %v304_v60 }
 0x3bd   :  { %v307_v62 = vsel %vm54_vm1, %v303_v61, 0.0 }
 0x3be   :  { %308 = vadd.xlane.f32.xlu0 %v307_v62  ;;  %v559_v62 = vld [vmem:[%s921_s12] ss:$0 sm:$0xff] }
 0x449   :  { %v306_v2 = vpop.xlane.xlu1 %305 }
 0x44a   :  { %v317_v5 = vrot.slane %v306_v2, %v834_v1 }
 0x44b   :  { %v309_v4 = vpop.xlane.xlu0 %308 }
 0x44c   :  { %v321_v6 = vrot.slane %v309_v4, %v834_v1 }
 0x44e   :  { %v323_v7 = vsel %vm322_vm3, %v321_v6, %v317_v5 }
 0x44f   :  { %v325_v8 = vsel %vm170_vm4, -1e+30, %v323_v7 }
 0x450   :  { %v327_v9 = vsel %vm326_vm5, %v325_v8, -inf }
 0x451   :  { %328 = vmax.xlane.f32.xlu0 %v327_v9 }
 0x4de   :  { %v329_v10 = vpop.xlane.xlu0 %328 }
 0x4df   :  { %v330_v11 = vsub.f32 %v325_v8, %v329_v10 }
 0x4e1   :  { %v331_v12 = vmul.f32 1.442695, %v330_v11 }
 0x4e3   :  { %645 = vpow2.f32 %v331_v12 }
 0x4ed   :  { %v646_v13 = vpop.eup %645 }
 0x4ee   :  { %v333_v14 = vsel %vm326_vm5, %v646_v13, 0.0 }
 0x4ef   :  { %334 = vadd.xlane.f32.xlu1 %v333_v14 }
 0x57c   :  { %v335_v15 = vpop.xlane.xlu1 %334 }
 0x57d   :  { %647 = vrcp.f32 %v335_v15 }
 0x587   :  { %v648_v20 = vpop.eup %647 }
 0x588   :  { %v337_v21 = vmul.f32 %v648_v20, %v646_v13 }
 0x58a   :  { %v348_v25 = vrot.slane %v337_v21, %v347_v18  ;;  %v341_v26 = vrot.slane %v337_v21, %v813_v46 }
 0x58c   :  { %350 = vbcast.lane.b32.xlu1 %v348_v25, 256  ;;  %343 = vbcast.lane.b32.xlu0 %v341_v26, 256 }
 0x5fe   :  { %v351_v28 = vpop.permute.xlu1 %350  ;;  %v344_v29 = vpop.permute.xlu0 %343 }
 0x5ff   :  { %v353_v30 = vmul.f32 %v351_v28, %v172_v52  ;;  %v352_v0 = vmul.f32 %v344_v29, %v819_v49 }
 0x601   :  { %v361_v31 = vsel %vm54_vm1, %v353_v30, 0.0  ;;  %v354_v32 = vsel %vm54_vm1, %v352_v0, 0.0 }
 0x602   :  { %v362_v33 = vrot.slane %v361_v31, 4  ;;  %v355_v34 = vrot.slane %v354_v32, 4 }
 0x604   :  { %v363_v35 = vadd.f32 %v362_v33, %v361_v31  ;;  %v356_v36 = vadd.f32 %v355_v34, %v354_v32 }
 0x606   :  { %v364_v37 = vrot.slane %v363_v35, 2  ;;  %v357_v38 = vrot.slane %v356_v36, 2 }
 0x608   :  { %v365_v39 = vadd.f32 %v364_v37, %v363_v35  ;;  %v358_v40 = vadd.f32 %v357_v38, %v356_v36 }
 0x60a   :  { %v366_v42 = vrot.slane %v365_v39, 1  ;;  %v359_v43 = vrot.slane %v358_v40, 1 }
 0x60c   :  { %v367_v44 = vadd.f32 %v366_v42, %v365_v39  ;;  %v360_v45 = vadd.f32 %v359_v43, %v358_v40 }
 0x60e   :  { %v381_v47 = vsel %vm322_vm3, %v367_v44, %v360_v45 }
 0x60f   :  { %606 = vmatmul.mubr.msk.f32.vlgmr.msra.gmra.mrb[2].mxu0 %vm54_vm1, %v381_v47 }
 0x6e2   :  { %v450_v49 = vpop.f32.mrb[2].mxu0 }
 0x6e3   :  { %v451_v50 = vadd.f32 %v557_v48, %v450_v49  ;;  %v607_v51 = vpop.f32.mrb[3].mxu0 }
 0x6e5   :  { %v461_v52 = vrot.slane %v451_v50, %v809_v41 }
 0x6e7   :  { %v462_v53 = vcombine.high %v461_v52, %v461_v52  ;;  %v469_v54 = vrot.slane %v461_v52, %v809_v41 }
 0x6e9   :  { %v476_v56 = vrot.slane %v462_v53, %v809_v41  ;;  %v480_v57 = vrot.slane %v469_v54, %v813_v46 }
 0x6eb   :  { %v484_v59 = vrot.slane %v476_v56, %v813_v46  ;;  %v487_v60 = vadd.f32 %v480_v57, %v173_v55 }
 0x6ed   :  { %v488_v61 = vadd.f32 %v484_v59, %v174_v58  ;;  %649 = vtanh.f32 %v487_v60 }
 0x6ef   :  { %651 = vtanh.f32 %v488_v61 }
 0x6f7   :  { %v650_v63 = vpop.eup %649 }
 0x6f8   :  { %v498_v2 = vmul.f32 %v650_v63, %v559_v62 }
 0x6f9   :  { %v652_v4 = vpop.eup %651 }
 0x6fa   :  { %v500_v41 = vsel %vm54_vm1, %v498_v2, 0.0  ;;  %v499_v5 = vmul.f32 %v652_v4, %v559_v62 }
 0x6fb   :  { %501 = vadd.xlane.f32.xlu1 %v500_v41 }
 0x6fc   :  { %v503_v6 = vsel %vm54_vm1, %v499_v5, 0.0 }
 0x6fd   :  { %504 = vadd.xlane.f32.xlu0 %v503_v6 }
 0x788   :  { %v502_v7 = vpop.xlane.xlu1 %501 }
 0x789   :  { %653 = vtanh.f32 %v502_v7 }
 0x78a   :  { %v505_v46 = vpop.xlane.xlu0 %504 }
 0x78b   :  { %655 = vtanh.f32 %v505_v46 }
 0x793   :  { %v654_v8 = vpop.eup %653 }
 0x794   :  { %v508_v9 = vmul.f32 10.0, %v654_v8 }
 0x795   :  { %v656_v10 = vpop.eup %655 }
 0x796   :  { %v509_v11 = vmul.f32 10.0, %v656_v10  ;;  %v515_v12 = vrot.slane %v508_v9, %v834_v1 }
 0x798   :  { %v519_v13 = vrot.slane %v509_v11, %v834_v1 }
 0x79a   :  { %v520_v14 = vsel %vm322_vm3, %v519_v13, %v515_v12 }
 0x79b   :  { %v522_v15 = vsel %vm170_vm4, -1e+30, %v520_v14 }
 0x79c   :  { %v524_v16 = vsel %vm326_vm5, %v522_v15, -inf  ;;  %523 = vst.msk [vmem:[%s922_s16] sm:$0x3] %vm326_vm5, %v522_v15 }
 0x79d   :  { %525 = vmax.xlane.f32.xlu0 %v524_v16 }
 0x7b3   :  { %165 = vrot.lane.b32.xlu0 %v782_v24, %s667_s7 }
 0x82a   :  { %v526_v17 = vpop.xlane.xlu0 %525 }
 0x82b   :  { %v527_v18 = vsub.f32 %v522_v15, %v526_v17 }
 0x82d   :  { %v528_v19 = vmul.f32 1.442695, %v527_v18 }
 0x82e   :  { %v166_v1 = vpop.permute.xlu0 %165 }
 0x82f   :  { %657 = vpow2.f32 %v528_v19  ;;  %168 = vst.msk [vmem:[%s923_s14] sm:$0x3] %vm162_vm2, %v166_v1 }
 0x839   :  { %v658_v3 = vpop.eup %657 }
 0x83a   :  { %v530_v20 = vsel %vm326_vm5, %v658_v3, 0.0 }
 0x83b   :  { %531 = vadd.xlane.f32.xlu1 %v530_v20 }
 0x8c8   :  { %v532_v21 = vpop.xlane.xlu1 %531 }
 0x8c9   :  { %659 = vrcp.f32 %v532_v21 }
 0x8d3   :  { %v660_v22 = vpop.eup %659 }
 0x8d4   :  { %v534_v23 = vmul.f32 %v660_v22, %v658_v3 }
 0x8d6   :  { %535 = vst.msk [vmem:[%s924_s15] sm:$0x3] %vm326_vm5, %v534_v23 }

// kernel: _lambda_.22
= control target key start
LH: loop header
LB: loop body
LE: loop exit
PB: predicated region body
PF: predicated region fallthrough
CT: control target
= control target key end

     0   :  { %s1030_s0 = inlined_call_operand.vmem [shape: f32[8,2,8], index: 0, kind: input, shape index: {}, may-alias: {0,14}]   ;;  %s1031_s1 = inlined_call_operand.vmem [shape: f32[2,128], index: 1, kind: input, shape index: {}]   ;;  %s1032_s2 = inlined_call_operand.vmem [shape: f32[2,32], index: 2, kind: input, shape index: {}]   ;;  %s1033_s3 = inlined_call_operand.vmem [shape: f32[2,32], index: 3, kind: input, shape index: {}]   ;;  %s1034_s4 = inlined_call_operand.vmem [shape: f32[2,8], index: 4, kind: input, shape index: {}]   ;;  %s1035_s5 = inlined_call_operand.vmem [shape: f32[32,128], index: 5, kind: input, shape index: {}]   ;;  %s1036_s6 = inlined_call_operand.vmem [shape: f32[2,8,32], index: 6, kind: input, shape index: {}]   ;;  %s1037_s7 = inlined_call_operand.vmem [shape: f32[2,8,32], index: 7, kind: input, shape index: {}]   ;;  %s1038_s8 = inlined_call_operand.vmem [shape: f32[32,32], index: 8, kind: input, shape index: {}]   ;;  %s1039_s9 = inlined_call_operand.vmem [shape: f32[1,32], index: 9, kind: input, shape index: {}]   ;;  %s1040_s10 = inlined_call_operand.vmem [shape: f32[1,32], index: 10, kind: input, shape index: {}]   ;;  %s1041_s11 = inlined_call_operand.vmem [shape: f32[32,32], index: 11, kind: input, shape index: {}]   ;;  %s1042_s12 = inlined_call_operand.vmem [shape: f32[1,32], index: 12, kind: input, shape index: {}]   ;;  %s1043_s13 = inlined_call_operand.vmem [shape: f32[1,32], index: 13, kind: input, shape index: {}]   ;;  %s1044_s14 = inlined_call_operand.vmem [shape: f32[8,2,8], index: 14, kind: output, shape index: {0}, may-alias: {0,14}]   ;;  %s1045_s15 = inlined_call_operand.vmem [shape: f32[2,8], index: 15, kind: output, shape index: {1}]   ;;  %s1046_s16 = inlined_call_operand.hbm [shape: f32[2,32], index: 16, kind: output, shape index: {2}]   ;;  %s1047_s17 = inlined_call_operand.hbm [shape: f32[2,32], index: 17, kind: output, shape index: {3}]  }
   0x1   :  { %1048 = sst [smem:[#allocation9_spill]] %s1031_s1 }
   0x2   :  { %24 = vsyncpa [#allocation3], 0  ;;  %v54_v0 = vld [vmem:[%s1035_s5] sm:$0xff]  ;;  %v55_v1 = vld [vmem:[%s1035_s5 + $0x8] sm:$0xff]  ;;  %v771_v3 = vmov 0.0|0.0   ;;  %vm772_vm0 = vmmov 0  }
   0x3   :  { %v56_v2 = vld [vmem:[%s1035_s5 + $0x10] sm:$0xff]  ;;  %668 = vmatprep.subr.bf16.mxu0 %v771_v3  ;;  %v669_v4 = vpack.c.bf16 %v55_v1, %v54_v0  ;;  %v57_v5 = vld [vmem:[%s1035_s5 + $0x18] sm:$0xff]  ;;  %v773_v6 = vmov 0.0   ;;  %674 = vmatprep.subr.bf16.mxu1 %v771_v3 }
   0x4   :  { %643 = vmatprep.mubr.msk.f32.mxu0 %vm772_vm0, %v773_v6  ;;  %654 = vmatprep.mubr.msk.f32.mxu1 %vm772_vm0, %v773_v6 }
   0x5   :  { %25 = vsyncpa [#allocation5], 0  ;;  %670 = vmatpush3.bf16.msra.mxu0 %v669_v4  ;;  %v672_v7 = vpack.c.bf16 %v57_v5, %v56_v2  ;;  %v53_v8 = vld [vmem:[%s1032_s2] sm:$0x3]  ;;  %vm58_vm1 = vcmask 261120   ;;  %s1049_s20 = sld [smem:[#allocation9_spill]]  ;;  %v266_v37 = vlaneseq }
   0x6   :  { %671 = vmatprep.subr.bf16.mxu0 %v771_v3  ;;  %s774_s21 = smov 64   ;;  %v133_v14 = vld [vmem:[%s1033_s3] sm:$0x3]  ;;  %s775_s2 = smov 32   ;;  %v180_v26 = vld [vmem:[%s1038_s8 + $0x8] sm:$0xff]  ;;  %v181_v27 = vld [vmem:[%s1038_s8 + $0x10] sm:$0xff] }
   0x7   :  { %v179_v25 = vld [vmem:[%s1038_s8] sm:$0xff]  ;;  %v182_v29 = vld [vmem:[%s1038_s8 + $0x18] sm:$0xff]  ;;  %vm166_vm2 = vcmask 254976   ;;  %v776_v35 = vmov 1966171168   ;;  %v267_v39 = vshrl.u32 %v266_v37, 7 }
   0x8   :  { %v675_v28 = vpack.c.bf16 %v180_v26, %v179_v25  ;;  %v678_v30 = vpack.c.bf16 %v182_v29, %v181_v27  ;;  %v264_v36 = vunpack.c.l.s4 %v776_v35  ;;  %v613_v40 = vld [vmem:[%s1039_s9] ss:$0 sm:$0xff]  ;;  %v176_v52 = vld [vmem:[%s1036_s6 + $0x8] sm:$0xff]  ;;  %v317_v63 = vand.u32 127, %v266_v37  ;;  %s777_s0 = smov 96   ;;  %s778_s18 = smov [#allocation2]  }
   0x9   :  { %673 = vmatpush3.bf16.msra.mxu0 %v672_v7  ;;  %v920_v46 = vsub.s32 0, %v267_v39  ;;  %v175_v49 = vld [vmem:[%s1036_s6] sm:$0xff]  ;;  %vm326_vm3 = vcmask 1041409   ;;  %vm330_vm5 = vcmask 58368   ;;  %s546_s19 = sshll.u32 %s778_s18, 4  ;;  %s779_s9 = smov [#allocation4]   ;;  %s547_s19 = int_to_ptr.vmem [resolvable:$true] %s546_s19 }
   0xa   :  { %680 = vmatprep.subr.bf16.mxu0 %v771_v3  ;;  %676 = vmatpush3.bf16.msra.mxu1 %v675_v28  ;;  %v265_v38 = vunpack.c.0.s8 %v264_v36  ;;  %v615_v56 = vld [vmem:[%s1040_s10] ss:$0 sm:$0xff]  ;;  %v937_v0 = vsub.s32 %v317_v63, %v267_v39  ;;  %s556_s5 = sshll.u32 %s779_s9, 4  ;;  %p728_p1 = scmp.lt.s32.totalorder %s547_s19, %s547_s19  ;;  %s557_s5 = int_to_ptr.vmem [resolvable:$true] %s556_s5 }
   0xb   :  { %v52_v9 = vld [vmem:[%s1049_s20] sm:$0x3]  ;;  %677 = vmatprep.subr.bf16.mxu1 %v771_v3 }
   0xc   :  { %644 = vmatmul.mubr.msk.f32.vlgmr.msra.gmra.mrb[0].mxu0 %vm58_vm1, %v53_v8  ;;  %v917_v41 = vsub.s32 %v265_v38, %v267_v39  ;;  %v942_v2 = vld [vmem:[%s1034_s4] sm:$0x3] }
   0xd   :  { %665 = vmatprep.mubr.msk.f32.mxu0 %vm772_vm0, %v773_v6  ;;  %vm174_vm4 = vcmp.gt.f32.partialorder %v942_v2, 0.5 }
   0xe   :  { %679 = vmatpush3.bf16.msra.mxu1 %v678_v30 }
  0xdf   :  { %v128_v10 = vpop.f32.mrb[0].mxu0 }
  0xe0   :  { %v132_v11 = vadd.f32 %v128_v10, %v52_v9  ;;  %v645_v12 = vpop.f32.mrb[1].mxu0 }
  0xe2   :  { %695 = vtanh.f32 %v132_v11  ;;  %v612_v15 = vmul.f32 -1.442695, %v132_v11 }
  0xe4   :  { %697 = vpow2.f32 %v612_v15 }
  0xec   :  { %v696_v13 = vpop.eup %695 }
  0xed   :  { %147 = vrot.lane.b32.xlu0 %v696_v13, %s774_s21 }
  0xee   :  { %v698_v16 = vpop.eup %697 }
  0xef   :  { %v137_v17 = vadd.f32 1.0, %v698_v16  ;;  %v372_v16 = vld [vmem:[%s1041_s11] sm:$0xff] }
  0xf1   :  { %142 = vrot.lane.b32.xlu0 %v133_v14, %s775_s2  ;;  %699 = vrcp.f32 %v137_v17  ;;  %v373_v17 = vld [vmem:[%s1041_s11 + $0x8] sm:$0xff] }
  0xfb   :  { %v700_v18 = vpop.eup %699 }
 0x15f   :  { %v148_v19 = vpop.permute.xlu0 %147 }
 0x160   :  { %v150_v20 = vmul.f32 %v700_v18, %v148_v19  ;;  %v681_v19 = vpack.c.bf16 %v373_v17, %v372_v16 }
 0x162   :  { %152 = vrot.lane.b32.xlu1 %v150_v20, %s775_s2  ;;  %682 = vmatpush3.bf16.msra.mxu0 %v681_v19 }
 0x163   :  { %v143_v21 = vpop.permute.xlu0 %142  ;;  %683 = vmatprep.subr.bf16.mxu0 %v771_v3 }
 0x164   :  { %v145_v22 = vmul.f32 %v700_v18, %v143_v21 }
 0x1d4   :  { %v153_v23 = vpop.permute.xlu1 %152 }
 0x1d5   :  { %v896_v24 = vadd.f32 %v153_v23, %v145_v22  ;;  %v374_v22 = vld [vmem:[%s1041_s11 + $0x10] sm:$0xff]  ;;  %v375_v23 = vld [vmem:[%s1041_s11 + $0x18] sm:$0xff] }
 0x1d6   :  { %v684_v27 = vpack.c.bf16 %v375_v23, %v374_v22 }
 0x1d7   :  { %701 = vtanh.f32 %v896_v24 }
 0x1d8   :  { %685 = vmatpush3.bf16.msra.mxu0 %v684_v27 }
 0x1e1   :  { %v702_v31 = vpop.eup %701 }
 0x1e2   :  { %158 = vrot.lane.b32.xlu1 %v702_v31, %s774_s21 }
 0x254   :  { %v159_v32 = vpop.permute.xlu1 %158 }
 0x255   :  { %v161_v33 = vmul.f32 %v700_v18, %v159_v32  ;;  %v351_v18 = vsub.s32 1, %v267_v39 }
 0x257   :  { %163 = vrot.lane.b32.xlu0 %v161_v33, %s775_s2 }
 0x2c9   :  { %v164_v34 = vpop.permute.xlu0 %163 }
 0x2ca   :  { %655 = vmatmul.mubr.msk.f32.vlgmr.msra.gmra.mrb[0].mxu1 %vm58_vm1, %v164_v34  ;;  %167 = vst.msk [vmem:[#allocation2] sm:$0x3] %vm166_vm2, %v164_v34 }
 0x39d   :  { %v258_v42 = vpop.f32.mrb[0].mxu1 }
 0x39e   :  { %v259_v43 = vadd.f32 %v613_v40, %v258_v42  ;;  %v656_v44 = vpop.f32.mrb[1].mxu1 }
 0x3a0   :  { %v269_v45 = vrot.slane %v259_v43, %v917_v41 }
 0x3a2   :  { %v270_v47 = vcombine.high %v269_v45, %v269_v45  ;;  %v277_v48 = vrot.slane %v269_v45, %v917_v41 }
 0x3a4   :  { %v284_v50 = vrot.slane %v270_v47, %v917_v41  ;;  %v288_v51 = vrot.slane %v277_v48, %v920_v46  ;;  %v616_v48 = vld [vmem:[%s1042_s12] ss:$0 sm:$0xff] }
 0x3a6   :  { %v292_v53 = vrot.slane %v284_v50, %v920_v46  ;;  %v295_v54 = vadd.f32 %v288_v51, %v175_v49 }
 0x3a8   :  { %v296_v55 = vadd.f32 %v292_v53, %v176_v52  ;;  %703 = vtanh.f32 %v295_v54 }
 0x3aa   :  { %705 = vtanh.f32 %v296_v55  ;;  %v177_v55 = vld [vmem:[%s1037_s7] sm:$0xff] }
 0x3b2   :  { %v704_v57 = vpop.eup %703 }
 0x3b3   :  { %v306_v58 = vmul.f32 %v704_v57, %v615_v56 }
 0x3b4   :  { %v706_v59 = vpop.eup %705 }
 0x3b5   :  { %v308_v60 = vsel %vm58_vm1, %v306_v58, 0.0  ;;  %v307_v61 = vmul.f32 %v706_v59, %v615_v56  ;;  %v178_v58 = vld [vmem:[%s1037_s7 + $0x8] sm:$0xff] }
 0x3b6   :  { %309 = vadd.xlane.f32.xlu1 %v308_v60 }
 0x3b7   :  { %v311_v62 = vsel %vm58_vm1, %v307_v61, 0.0 }
 0x3b8   :  { %312 = vadd.xlane.f32.xlu0 %v311_v62  ;;  %v618_v62 = vld [vmem:[%s1043_s13] ss:$0 sm:$0xff] }
 0x443   :  { %v310_v1 = vpop.xlane.xlu1 %309 }
 0x444   :  { %v321_v5 = vrot.slane %v310_v1, %v937_v0 }
 0x445   :  { %v313_v4 = vpop.xlane.xlu0 %312 }
 0x446   :  { %v325_v6 = vrot.slane %v313_v4, %v937_v0 }
 0x448   :  { %v327_v7 = vsel %vm326_vm3, %v325_v6, %v321_v5 }
 0x449   :  { %v329_v8 = vsel %vm174_vm4, -1e+30, %v327_v7 }
 0x44a   :  { %v331_v9 = vsel %vm330_vm5, %v329_v8, -inf }
 0x44b   :  { %332 = vmax.xlane.f32.xlu0 %v331_v9 }
 0x4d8   :  { %v333_v10 = vpop.xlane.xlu0 %332 }
 0x4d9   :  { %v334_v11 = vsub.f32 %v329_v8, %v333_v10 }
 0x4db   :  { %v335_v12 = vmul.f32 1.442695, %v334_v11 }
 0x4dd   :  { %707 = vpow2.f32 %v335_v12 }
 0x4e7   :  { %v708_v13 = vpop.eup %707 }
 0x4e8   :  { %v337_v14 = vsel %vm330_vm5, %v708_v13, 0.0 }
 0x4e9   :  { %338 = vadd.xlane.f32.xlu1 %v337_v14 }
 0x576   :  { %v339_v15 = vpop.xlane.xlu1 %338 }
 0x577   :  { %709 = vrcp.f32 %v339_v15 }
 0x581   :  { %v710_v20 = vpop.eup %709 }
 0x582   :  { %v341_v21 = vmul.f32 %v710_v20, %v708_v13 }
 0x584   :  { %v352_v25 = vrot.slane %v341_v21, %v351_v18  ;;  %v345_v26 = vrot.slane %v341_v21, %v920_v46 }
 0x586   :  { %354 = vbcast.lane.b32.xlu1 %v352_v25, 256  ;;  %347 = vbcast.lane.b32.xlu0 %v345_v26, 256 }
 0x5f8   :  { %v355_v28 = vpop.permute.xlu1 %354  ;;  %v348_v29 = vpop.permute.xlu0 %347 }
 0x5f9   :  { %v357_v30 = vmul.f32 %v355_v28, %v176_v52  ;;  %v356_v31 = vmul.f32 %v348_v29, %v175_v49 }
 0x5fb   :  { %v365_v3 = vsel %vm58_vm1, %v357_v30, 0.0  ;;  %v358_v32 = vsel %vm58_vm1, %v356_v31, 0.0 }
 0x5fc   :  { %v366_v33 = vrot.slane %v365_v3, 4  ;;  %v359_v34 = vrot.slane %v358_v32, 4 }
 0x5fe   :  { %v367_v35 = vadd.f32 %v366_v33, %v365_v3  ;;  %v360_v36 = vadd.f32 %v359_v34, %v358_v32 }
 0x600   :  { %v368_v37 = vrot.slane %v367_v35, 2  ;;  %v361_v38 = vrot.slane %v360_v36, 2 }
 0x602   :  { %v369_v39 = vadd.f32 %v368_v37, %v367_v35  ;;  %v362_v40 = vadd.f32 %v361_v38, %v360_v36 }
 0x604   :  { %v370_v42 = vrot.slane %v369_v39, 1  ;;  %v363_v43 = vrot.slane %v362_v40, 1 }
 0x606   :  { %v371_v44 = vadd.f32 %v370_v42, %v369_v39  ;;  %v364_v45 = vadd.f32 %v363_v43, %v362_v40 }
 0x608   :  { %v385_v47 = vsel %vm326_vm3, %v371_v44, %v364_v45 }
 0x609   :  { %666 = vmatmul.mubr.msk.f32.vlgmr.msra.gmra.mrb[2].mxu0 %vm58_vm1, %v385_v47 }
 0x6dc   :  { %v454_v49 = vpop.f32.mrb[2].mxu0 }
 0x6dd   :  { %v455_v50 = vadd.f32 %v616_v48, %v454_v49  ;;  %v667_v51 = vpop.f32.mrb[3].mxu0 }
 0x6df   :  { %v465_v52 = vrot.slane %v455_v50, %v917_v41 }
 0x6e1   :  { %v466_v53 = vcombine.high %v465_v52, %v465_v52  ;;  %v473_v54 = vrot.slane %v465_v52, %v917_v41 }
 0x6e3   :  { %v480_v56 = vrot.slane %v466_v53, %v917_v41  ;;  %v484_v57 = vrot.slane %v473_v54, %v920_v46 }
 0x6e5   :  { %v488_v59 = vrot.slane %v480_v56, %v920_v46  ;;  %v491_v60 = vadd.f32 %v484_v57, %v177_v55 }
 0x6e7   :  { %v492_v61 = vadd.f32 %v488_v59, %v178_v58  ;;  %711 = vtanh.f32 %v491_v60 }
 0x6e9   :  { %713 = vtanh.f32 %v492_v61 }
 0x6f1   :  { %v712_v63 = vpop.eup %711 }
 0x6f2   :  { %v502_v1 = vmul.f32 %v712_v63, %v618_v62 }
 0x6f3   :  { %v714_v4 = vpop.eup %713 }
 0x6f4   :  { %v504_v41 = vsel %vm58_vm1, %v502_v1, 0.0  ;;  %v503_v5 = vmul.f32 %v714_v4, %v618_v62 }
 0x6f5   :  { %505 = vadd.xlane.f32.xlu1 %v504_v41 }
 0x6f6   :  { %v507_v6 = vsel %vm58_vm1, %v503_v5, 0.0 }
 0x6f7   :  { %508 = vadd.xlane.f32.xlu0 %v507_v6 }
 0x782   :  { %v506_v7 = vpop.xlane.xlu1 %505 }
 0x783   :  { %715 = vtanh.f32 %v506_v7 }
 0x784   :  { %v509_v46 = vpop.xlane.xlu0 %508 }
 0x785   :  { %717 = vtanh.f32 %v509_v46 }
 0x78d   :  { %v716_v8 = vpop.eup %715 }
 0x78e   :  { %v512_v9 = vmul.f32 10.0, %v716_v8 }
 0x78f   :  { %v718_v10 = vpop.eup %717 }
 0x790   :  { %v513_v11 = vmul.f32 10.0, %v718_v10  ;;  %v519_v12 = vrot.slane %v512_v9, %v937_v0 }
 0x792   :  { %v523_v13 = vrot.slane %v513_v11, %v937_v0 }
 0x794   :  { %v524_v14 = vsel %vm326_vm3, %v523_v13, %v519_v12 }
 0x795   :  { %v526_v15 = vsel %vm174_vm4, -1e+30, %v524_v14 }
 0x796   :  { %v528_v16 = vsel %vm330_vm5, %v526_v15, -inf  ;;  %527 = vst.msk [vmem:[%s1045_s15] sm:$0x3] %vm330_vm5, %v526_v15  ;;  %s723_s15 = scalar_lea.vmem %s547_s19, 32 }
 0x797   :  { %529 = vmax.xlane.f32.xlu0 %v528_v16  ;;  %p724_p0 = scmp.ne.s32.totalorder %s547_s19, %s723_s15  ;;  %p729_p2 = scmp.lt.s32.totalorder %s723_s15, %s723_s15 }
 0x799   :  { %p730_p3 = por %p729_p2, %p728_p1 }
 0x79b   :  { %p731_p4 = pnand %p730_p3, %p724_p0 }
 0x7ad   :  { %169 = vrot.lane.b32.xlu0 %v896_v24, %s777_s0 }
 0x824   :  { %v530_v17 = vpop.xlane.xlu0 %529 }
 0x825   :  { %v531_v18 = vsub.f32 %v526_v15, %v530_v17 }
 0x827   :  { %v532_v19 = vmul.f32 1.442695, %v531_v18 }
 0x828   :  { %v170_v0 = vpop.permute.xlu0 %169 }
 0x829   :  { %719 = vpow2.f32 %v532_v19  ;;  %172 = vst.msk [vmem:[#allocation4] sm:$0x3] %vm166_vm2, %v170_v0 }
 0x833   :  { %v720_v2 = vpop.eup %719 }
 0x834   :  { %v534_v20 = vsel %vm330_vm5, %v720_v2, 0.0 }
 0x835   :  { %535 = vadd.xlane.f32.xlu1 %v534_v20 }
 0x836   :  { %734 = shalt.err (!%p731_p4)
}
 0x837   :  { %s735_s6 = scalar_lea.hbm %s1046_s16, 32 }
 0x838   :  { %p736_p5 = scmp.ne.s32.totalorder %s1046_s16, %s735_s6  ;;  %p739_p6 = scmp.lt.u32.totalorder %s735_s6, %s1046_s16 }
 0x83a   :  { %p741_p7 = pnand %p739_p6, %p736_p5 }
 0x83c   :  { %744 = shalt.err (!%p741_p7)
}
 0x83d   :  { %549 = dma.vmem_to_hbm [thread:$0]  %s547_s19, 32, %s1046_s16, [#allocation3]  }
 0x83e   :  { %s745_s24 = scalar_lea.vmem %s557_s5, 32  ;;  %p750_p9 = scmp.lt.s32.totalorder %s557_s5, %s557_s5 }
 0x83f   :  { %p746_p8 = scmp.ne.s32.totalorder %s557_s5, %s745_s24  ;;  %p751_p10 = scmp.lt.s32.totalorder %s745_s24, %s745_s24 }
 0x841   :  { %p752_p11 = por %p751_p10, %p750_p9 }
 0x843   :  { %p753_p12 = pnand %p752_p11, %p746_p8 }
 0x845   :  { %756 = shalt.err (!%p753_p12)
}
 0x846   :  { %s757_s11 = scalar_lea.hbm %s1047_s17, 32 }
 0x847   :  { %p758_p13 = scmp.ne.s32.totalorder %s1047_s17, %s757_s11  ;;  %p761_p0 = scmp.lt.u32.totalorder %s757_s11, %s1047_s17 }
 0x849   :  { %p763_p1 = pnand %p761_p0, %p758_p13 }
 0x84b   :  { %766 = shalt.err (!%p763_p1)
}
 0x84c   :  { %559 = dma.vmem_to_hbm [thread:$0]  %s557_s5, 32, %s1047_s17, [#allocation5]  }
 0x8c2   :  { %v536_v24 = vpop.xlane.xlu1 %535 }
 0x8c3   :  { %721 = vrcp.f32 %v536_v24 }
 0x8cd   :  { %v722_v21 = vpop.eup %721 }
 0x8ce   :  { %v538_v22 = vmul.f32 %v722_v21, %v720_v2 }
 0x8d0   :  { %539 = vst.msk [vmem:[#allocation6] sm:$0x3] %vm330_vm5, %v538_v22 }
 0x8d7   :  { %v577_v23 = vld [vmem:[#allocation6] sm:$0x3] }
 0x8d8   :  { %619 = vst [vmem:[%s1044_s14 + $0xe] sm:$0x3] %v577_v23 }
 0x8d9   :  { %767 = dma.done.wait [#allocation3], 32  }
 0x8da   :  { %768 = vsyncadd [#allocation3], 4294967264 }
 0x8db   :  { %769 = dma.done.wait [#allocation5], 32  }
 0x8dc   :  { %770 = vsyncadd [#allocation5], 4294967264 }
 0x8dd   :  { %605 = vsyncpa [#allocation3], 1 }
 0x8de   :  { %606 = vsyncpa [#allocation5], 1 }

</bundles_post_ra>
